<compile_context>
chip_gen: v7x
topology: tpu7x:2x2x1
jax: 0.10.0
libtpu: 0.0.40
codegen_flags: <defaults>
</compile_context>

<pallas_src>
import functools

import jax
import jax.numpy as jnp
from jax.experimental import pallas as pl
from jax.experimental.pallas import tpu as pltpu

_SUBQ = 16  # sublane quantum covering both f32 (8) and bf16 (16) block tiling


def _round_up(x, m):
    return ((x + m - 1) // m) * m


def _lane_pad(n):
    return _round_up(max(int(n), 1), 128)


def _vmem_capacity_bytes():
    try:
        info = pltpu.get_tpu_info()
        return int(getattr(info, "vmem_capacity_bytes", 64 << 20))
    except Exception:
        return 64 << 20


def _block_vmem_bytes(mbt, cand_num, f, d, nsc, esize, wa):
    """Conservative per-grid-step VMEM footprint (double-buffered, lane-padded)."""
    x_b = 2 * cand_num * mbt * _lane_pad(f) * esize
    edge_b = 2 * 2 * cand_num * wa * _lane_pad(f) * esize
    w_b = 2 * _round_up(f, _SUBQ) * _lane_pad(d) * esize
    coef_b = 2 * cand_num * mbt * _lane_pad(nsc) * 4
    out_b = 2 * cand_num * mbt * _lane_pad(d) * 4
    h_b = cand_num * (mbt + 2 * wa) * _lane_pad(d) * 4
    bias_b = 2 * _SUBQ * _lane_pad(d) * 4
    return x_b + edge_b + w_b + coef_b + out_b + h_b + bias_b


def _pick_mention_tile(num_mentions, cand_num, max_f, max_d, nsc, esize, wa, budget):
    cap = _round_up(max(num_mentions, 1), _SUBQ)
    best = _SUBQ
    m = _SUBQ
    while m <= cap:
        if _block_vmem_bytes(m, cand_num, max_f, max_d, nsc, esize, wa) <= budget:
            best = m
        m *= 2
    best = min(best, cap)
    # keep at least two grid steps populated for v7x's two TensorCores
    if num_mentions >= 2 * _SUBQ:
        best = min(best, _round_up((num_mentions + 1) // 2, _SUBQ))
    return best


# ---------------------------------------------------------------------------
# Glue: aggregation coefficients (cascaded boundary masks + optional external
# mask folded in) and tiny block-aligned halo edge strips.  Pure index math.
# ---------------------------------------------------------------------------
def _build_coefficients(adj, graph_boundry, ext_mask, window):
    b, c = graph_boundry.shape
    ns = adj.shape[-1]
    adj3 = adj.reshape(b, c, ns).astype(jnp.float32)            # (B, Cq, NS)
    rmask = graph_boundry.astype(jnp.float32)                   # (B, Cc)
    zrow = jnp.zeros((1, c), jnp.float32)
    lmask = jnp.concatenate([zrow, rmask[:-1]], axis=0)

    casc = []
    cur = lmask                                                  # left, w = 0..W-1
    casc.append(cur)
    for _ in range(window - 1):
        cur = jnp.concatenate([zrow, cur[:-1]], axis=0) * lmask
        casc.append(cur)
    cur = rmask                                                  # right, w = 0..W-1
    casc.append(cur)
    for _ in range(window - 1):
        cur = jnp.concatenate([cur[1:], zrow], axis=0) * rmask
        casc.append(cur)
    casc = jnp.stack(casc, axis=1)                               # (B, 2W, Cc)

    adj_n = adj3[:, :, : ns - 1].reshape(b, c, 2 * window, c)    # (B, Cq, 2W, Cc)
    coef_n = adj_n * casc[:, None, :, :]
    coef = jnp.concatenate(
        [coef_n.reshape(b, c, ns - 1), adj3[:, :, ns - 1:]], axis=-1
    )                                                            # (B, Cq, NS)
    if ext_mask is not None:
        mcol = ext_mask.reshape(b, c, 1).astype(jnp.float32)
        coef = jnp.concatenate([coef, mcol], axis=-1)            # (B, Cq, NS+1)
    return coef.transpose(1, 0, 2)                               # (Cq, B, NS[+1])


def _gather_halo_edges(hT, mention_tile, window, wa, bp):
    """Per-block halo edge strips (C, nblocks*wa, F); real mentions sit at the
    tail (left edge) / head (right edge) of each wa-row group so the kernel can
    matmul + store full aligned slabs."""
    c, _, f = hT.shape
    nblocks = bp // mention_tile
    blk = jnp.arange(nblocks)
    t = jnp.arange(window)
    g_lo = blk[:, None] * mention_tile - window + t[None, :]     # (nblocks, W)
    g_hi = (blk[:, None] + 1) * mention_tile + t[None, :]

    def gather(g, pad_front):
        valid = ((g >= 0) & (g < bp)).astype(hT.dtype)
        gi = jnp.clip(g, 0, bp - 1).reshape(-1)
        rows = jnp.take(hT, gi, axis=1)                          # (C, nblocks*W, F)
        rows = rows * valid.reshape(1, nblocks * window, 1)
        rows = rows.reshape(c, nblocks, window, f)
        if pad_front:
            pad = ((0, 0), (0, 0), (wa - window, 0), (0, 0))
        else:
            pad = ((0, 0), (0, 0), (0, wa - window), (0, 0))
        rows = jnp.pad(rows, pad)
        return rows.reshape(c, nblocks * wa, f)

    return gather(g_lo, True), gather(g_hi, False)


# ---------------------------------------------------------------------------
# Fused per-layer kernel: matmul (MXU) for mention tile + halo, then neighbor
# aggregation (VPU broadcast-FMA over dense 2-D slabs) + bias + mask + ReLU.
# ---------------------------------------------------------------------------
def _subgraph_layer_kernel(x_ref, lo_ref, hi_ref, w_ref, b_ref, coef_ref, o_ref,
                           h_scr, *, window, wa, ns, has_mask, num_mentions):
    cand_num, mbt, _ = x_ref.shape
    wmat = w_ref[...]

    # dense layer matmul on the MXU, per candidate, for the tile + mention halo
    for c in range(cand_num):
        h_scr[c, :wa, :] = jnp.dot(
            lo_ref[c], wmat, preferred_element_type=jnp.float32)
        h_scr[c, wa:wa + mbt, :] = jnp.dot(
            x_ref[c], wmat, preferred_element_type=jnp.float32)
        h_scr[c, wa + mbt:, :] = jnp.dot(
            hi_ref[c], wmat, preferred_element_type=jnp.float32)

    bias = b_ref[...]                                            # (1, D)
    row_id = (pl.program_id(0) * mbt
              + jax.lax.broadcasted_iota(jnp.int32, (mbt, 1), 0))
    row_valid = (row_id < num_mentions).astype(jnp.float32)      # zero pad mentions

    # neighbor aggregation: per output candidate, unrolled broadcast-FMA over
    # the 2*window*cand_num neighbor terms + self term (all dense (mbt, D)).
    for q in range(cand_num):
        acc = coef_ref[q, :, ns - 1:ns] * h_scr[q, wa:wa + mbt, :]   # self
        j = 0
        for sgn in (-1, 1):
            for w in range(window):
                off = wa + sgn * (w + 1)
                for c in range(cand_num):
                    acc = acc + coef_ref[q, :, j:j + 1] * h_scr[c, off:off + mbt, :]
                    j += 1
        acc = acc + bias
        if has_mask:
            acc = acc * coef_ref[q, :, ns:ns + 1]
        acc = jnp.maximum(acc, 0.0) * row_valid
        o_ref[q] = acc.astype(o_ref.dtype)


def pallas_subgraph_layer(hT, coefT, weight, bias, *, window, wa, mention_tile,
                          num_mentions, ns, has_mask, mxu_dtype, out_dtype,
                          vmem_limit_bytes):
    cand_num, bp, f = hT.shape
    d = weight.shape[1]
    nsc = coefT.shape[-1]
    nblocks = bp // mention_tile

    x_in = hT.astype(mxu_dtype)
    lo, hi = _gather_halo_edges(x_in, mention_tile, window, wa, bp)
    w_in = weight.astype(mxu_dtype).reshape(f, d)
    b_in = bias.astype(jnp.float32).reshape(1, d)

    kernel = functools.partial(
        _subgraph_layer_kernel, window=window, wa=wa, ns=ns,
        has_mask=has_mask, num_mentions=num_mentions)

    return pl.pallas_call(
        kernel,
        out_shape=jax.ShapeDtypeStruct((cand_num, bp, d), out_dtype),
        grid=(nblocks,),
        in_specs=[
            pl.BlockSpec((cand_num, mention_tile, f), lambda i: (0, i, 0)),
            pl.BlockSpec((cand_num, wa, f), lambda i: (0, i, 0)),
            pl.BlockSpec((cand_num, wa, f), lambda i: (0, i, 0)),
            pl.BlockSpec((f, d), lambda i: (0, 0)),          # weight: fetched once
            pl.BlockSpec((1, d), lambda i: (0, 0)),
            pl.BlockSpec((cand_num, mention_tile, nsc), lambda i: (0, i, 0)),
        ],
        out_specs=pl.BlockSpec((cand_num, mention_tile, d), lambda i: (0, i, 0)),
        scratch_shapes=[
            pltpu.VMEM((cand_num, mention_tile + 2 * wa, d), jnp.float32)
        ],
        compiler_params=pltpu.CompilerParams(
            dimension_semantics=("parallel",),
            vmem_limit_bytes=vmem_limit_bytes,
        ),
    )(x_in, lo, hi, w_in, b_in, coefT)


# ---------------------------------------------------------------------------
# Forward pass (Pallas-backed)
# ---------------------------------------------------------------------------
def subgraph_convolution_forward(x, adj, graph_boundry, weights, biases, mask=None,
                                 mxu_dtype=jnp.bfloat16):
    total_batch, _, ns = adj.shape
    num_mentions, cand_num = graph_boundry.shape
    assert total_batch == num_mentions * cand_num
    window = (ns - 1) // (2 * cand_num)
    assert window >= 1, "SubGraphConvolution expects neighbor_size > 1"

    has_mask = mask is not None
    coefT = _build_coefficients(adj, graph_boundry, mask, window)   # (C, B, NS[+1])

    esize = jnp.dtype(mxu_dtype).itemsize
    wa = _round_up(window, _SUBQ)
    max_f = max([x.shape[1]] + [int(w.shape[0]) for w in weights])
    max_d = max(int(w.shape[1]) for w in weights)
    cap = _vmem_capacity_bytes()
    budget = (20 << 20) if cap >= (100 << 20) else (10 << 20)       # v5e/v6e vs v7x
    vmem_limit = (64 << 20) if cap >= (100 << 20) else (32 << 20)
    mention_tile = _pick_mention_tile(
        num_mentions, cand_num, max_f, max_d, coefT.shape[-1], esize, wa, budget)
    bp = _round_up(num_mentions, mention_tile)

    # candidate-major layout, mention axis zero-padded to a whole number of tiles
    xT = x.astype(jnp.float32).reshape(num_mentions, cand_num, -1).transpose(1, 0, 2)
    xT = jnp.pad(xT, ((0, 0), (0, bp - num_mentions), (0, 0)))
    coefT = jnp.pad(coefT, ((0, 0), (0, bp - num_mentions), (0, 0)))

    h = xT
    n_layers = len(weights)
    for li, (w, b) in enumerate(zip(weights, biases)):
        out_dtype = jnp.float32 if li == n_layers - 1 else mxu_dtype
        h = pallas_subgraph_layer(
            h, coefT, w, b, window=window, wa=wa, mention_tile=mention_tile,
            num_mentions=num_mentions, ns=ns, has_mask=has_mask,
            mxu_dtype=mxu_dtype, out_dtype=out_dtype,
            vmem_limit_bytes=vmem_limit)

    out = h[:, :num_mentions, :].transpose(1, 0, 2).reshape(total_batch, -1)
    return out


# ---------------------------------------------------------------------------
# Pure-JAX reference (direct mirror of the torch module, materializes gf)
# ---------------------------------------------------------------------------
def _get_neighbor_mask(graph_boundry, dim):
    batch_size, cand_num = graph_boundry.shape
    right_mask = graph_boundry.astype(jnp.float32)                       # (B, C)
    margin_col = jnp.zeros((1, cand_num), jnp.float32)
    left_mask = jnp.concatenate([margin_col, right_mask[:-1, :]], axis=0)
    tb = batch_size * cand_num
    right_exp = jnp.broadcast_to(right_mask.reshape(-1)[:, None], (tb, dim))
    left_exp = jnp.broadcast_to(left_mask.reshape(-1)[:, None], (tb, dim))
    return left_exp, right_exp


def _left_neighbor(emb, mv_steps, margin_col, mask):
    return jnp.concatenate([margin_col, emb[:-mv_steps, :]], axis=0) * mask


def _right_neighbor(emb, mv_steps, margin_col, mask):
    return jnp.concatenate([emb[mv_steps:, :], margin_col], axis=0) * mask


def _expand_neigh_candidates(neigh_emb, batch_size, cand_num, dim):
    t = neigh_emb.reshape(batch_size, cand_num, dim)
    t = jnp.broadcast_to(t[:, None, :, :], (batch_size, cand_num, cand_num, dim))
    return t.reshape(batch_size * cand_num, cand_num, dim)


def _get_expand_feature(f, window, graph_boundry):
    _, dim = f.shape
    batch_size, cand_num = graph_boundry.shape
    left_mask, right_mask = _get_neighbor_mask(graph_boundry, dim)
    margin_col = jnp.zeros((cand_num, dim), f.dtype)

    left_list = [_left_neighbor(f, cand_num, margin_col, left_mask)]
    for i in range(window - 1):
        left_list.append(_left_neighbor(left_list[i], cand_num, margin_col, left_mask))
    left_cands = jnp.concatenate(
        [_expand_neigh_candidates(l, batch_size, cand_num, dim) for l in left_list], axis=1
    )

    right_list = [_right_neighbor(f, cand_num, margin_col, right_mask)]
    for i in range(window - 1):
        right_list.append(_right_neighbor(right_list[i], cand_num, margin_col, right_mask))
    right_cands = jnp.concatenate(
        [_expand_neigh_candidates(r, batch_size, cand_num, dim) for r in right_list], axis=1
    )

    neigh_cands = jnp.concatenate([left_cands, right_cands], axis=1)
    return jnp.concatenate([neigh_cands, f[:, None, :]], axis=1)         # (TB, NS, dim)


def subgraph_convolution_reference(x, adj, graph_boundry, weights, biases, mask=None):
    total_batch_size, _, neighbor_size = adj.shape
    batch_size, cand_num = graph_boundry.shape
    window = (neighbor_size - 1) // (2 * cand_num)

    h = x.astype(jnp.float32)
    for w, b in zip(weights, biases):
        dim = w.shape[1]
        h = jnp.matmul(h, w)
        gf = _get_expand_feature(h, window, graph_boundry)
        h = jnp.einsum("bij,bjd->bid", adj.astype(jnp.float32), gf)[:, 0, :]
        h = h + b[None, :]
        if mask is not None:
            h = h * jnp.broadcast_to(
                mask.reshape(-1)[:, None].astype(jnp.float32), (total_batch_size, dim)
            )
        h = jnp.maximum(h, 0.0)
    return h


# ---------------------------------------------------------------------------
if __name__ == "__main__":
    def run_case(name, batch_size, cand_num, in_features, layer_dims, window,
                 use_mask, mxu_dtype, rtol, atol, seed):
        total_batch = batch_size * cand_num
        neighbor_size = 2 * window * cand_num + 1
        key = jax.random.PRNGKey(seed)
        kx, kadj, kgb, kmask, *kw = jax.random.split(key, 4 + 2 * len(layer_dims))
        x = jax.random.normal(kx, (total_batch, in_features), dtype=jnp.float32)
        adj = jax.random.uniform(kadj, (total_batch, 1, neighbor_size), dtype=jnp.float32)
        graph_boundry = (
            jax.random.uniform(kgb, (batch_size, cand_num)) > 0.3
        ).astype(jnp.int32)
        ext_mask = None
        if use_mask:
            ext_mask = (
                jax.random.uniform(kmask, (batch_size, cand_num)) > 0.5
            ).astype(jnp.float32)

        # deterministic parameter init: uniform(-0.005, 0.005) (UniInitializer)
        weights, biases = [], []
        fdim = in_features
        for i, d in enumerate(layer_dims):
            weights.append(
                jax.random.uniform(kw[2 * i], (fdim, d), jnp.float32, -0.005, 0.005))
            biases.append(
                jax.random.uniform(kw[2 * i + 1], (d,), jnp.float32, -0.005, 0.005))
            fdim = d

        out = jax.block_until_ready(subgraph_convolution_forward(
            x, adj, graph_boundry, weights, biases, mask=ext_mask, mxu_dtype=mxu_dtype))
        ref = jax.block_until_ready(subgraph_convolution_reference(
            x, adj, graph_boundry, weights, biases, mask=ext_mask))
        assert out.shape == (total_batch, layer_dims[-1]), name
        assert jnp.allclose(out, ref, rtol=rtol, atol=atol), (
            f"{name}: max abs err {float(jnp.max(jnp.abs(out - ref)))}")

    # exact-parity checks with f32 MXU operands
    run_case("f32/no-mask", 2, 4, 16, [32], 1, False, jnp.float32, 1e-5, 1e-5, 0)
    run_case("f32/mask/2-layer/window2", 4, 4, 16, [32, 32], 2, True,
             jnp.float32, 1e-5, 1e-5, 1)
    # default bf16 MXU operands (performance mode) with loosened tolerance
    run_case("bf16/no-mask", 2, 4, 16, [32], 1, False, jnp.bfloat16, 5e-2, 5e-3, 0)
    run_case("bf16/mask/multi-block", 40, 4, 16, [32, 16], 2, True,
             jnp.bfloat16, 5e-2, 5e-3, 2)

    print("KERNEL_OK")
</pallas_src>

<mosaic_0001>
module attributes {stable_mosaic.version = 11 : i64} {
  func.func @_subgraph_layer_kernel(%arg0: i32, %arg1: memref<4x16x16xf32, #tpu.memory_space<vmem>>, %arg2: memref<4x16x16xf32, #tpu.memory_space<vmem>>, %arg3: memref<4x16x16xf32, #tpu.memory_space<vmem>>, %arg4: memref<16x32xf32, #tpu.memory_space<vmem>>, %arg5: memref<1x32xf32, #tpu.memory_space<vmem>>, %arg6: memref<4x16x9xf32, #tpu.memory_space<vmem>>, %arg7: memref<4x16x32xf32, #tpu.memory_space<vmem>>, %arg8: memref<4x48x32xf32, #tpu.memory_space<vmem>>) attributes {dimension_semantics = [#tpu.dimension_semantics<parallel>], iteration_bounds = array<i64: 1>, scalar_prefetch = 0 : i64, scratch_operands = 1 : i64, tpu.core_type = #tpu.core_type<tc>, window_params = [{transform_indices = @transform_0, window_bounds = array<i64: 4, 16, 16>}, {transform_indices = @transform_1, window_bounds = array<i64: 4, 16, 16>}, {transform_indices = @transform_2, window_bounds = array<i64: 4, 16, 16>}, {pipeline_mode = #tpu.pipeline_mode<synchronous>, transform_indices = @transform_3, window_bounds = array<i64: 16, 32>}, {pipeline_mode = #tpu.pipeline_mode<synchronous>, transform_indices = @transform_4, window_bounds = array<i64: 1, 32>}, {transform_indices = @transform_5, window_bounds = array<i64: 4, 16, 9>}, {transform_indices = @transform_6, window_bounds = array<i64: 4, 16, 32>}]} {
    %c0 = arith.constant 0 : index
    %c0_0 = arith.constant 0 : index
    %0 = vector.load %arg4[%c0, %c0_0] : memref<16x32xf32, #tpu.memory_space<vmem>>, vector<16x32xf32>
    %c0_1 = arith.constant 0 : index
    %c0_2 = arith.constant 0 : index
    %c0_3 = arith.constant 0 : index
    %1 = vector.load %arg2[%c0_1, %c0_2, %c0_3] : memref<4x16x16xf32, #tpu.memory_space<vmem>>, vector<1x16x16xf32>
    %2 = vector.shape_cast %1 : vector<1x16x16xf32> to vector<16x16xf32>
    %cst = arith.constant dense<0.000000e+00> : vector<16x32xf32>
    %3 = tpu.matmul %2, %0, %cst {dimension_numbers = #tpu.dot_dimension_numbers<[1], [0], [0], [1], [0, 0, 1, 1], [], []>} : vector<16x16xf32>, vector<16x32xf32>, vector<16x32xf32> -> vector<16x32xf32>
    %c0_4 = arith.constant 0 : index
    %c0_5 = arith.constant 0 : index
    %c0_6 = arith.constant 0 : index
    %4 = vector.load %arg8[%c0_4, %c0_5, %c0_6] : memref<4x48x32xf32, #tpu.memory_space<vmem>>, vector<1x16x32xf32>
    %5 = vector.shape_cast %4 : vector<1x16x32xf32> to vector<16x32xf32>
    %6 = vector.shape_cast %3 : vector<16x32xf32> to vector<1x16x32xf32>
    tpu.vector_store %arg8[%c0_4, %c0_5, %c0_6], %6 {strides = array<i32>} : memref<4x48x32xf32, #tpu.memory_space<vmem>>, vector<1x16x32xf32>,
    %c0_7 = arith.constant 0 : index
    %c0_8 = arith.constant 0 : index
    %c0_9 = arith.constant 0 : index
    %7 = vector.load %arg1[%c0_7, %c0_8, %c0_9] : memref<4x16x16xf32, #tpu.memory_space<vmem>>, vector<1x16x16xf32>
    %8 = vector.shape_cast %7 : vector<1x16x16xf32> to vector<16x16xf32>
    %cst_10 = arith.constant dense<0.000000e+00> : vector<16x32xf32>
    %9 = tpu.matmul %8, %0, %cst_10 {dimension_numbers = #tpu.dot_dimension_numbers<[1], [0], [0], [1], [0, 0, 1, 1], [], []>} : vector<16x16xf32>, vector<16x32xf32>, vector<16x32xf32> -> vector<16x32xf32>
    %c0_11 = arith.constant 0 : index
    %c16 = arith.constant 16 : index
    %c0_12 = arith.constant 0 : index
    %10 = vector.load %arg8[%c0_11, %c16, %c0_12] : memref<4x48x32xf32, #tpu.memory_space<vmem>>, vector<1x16x32xf32>
    %11 = vector.shape_cast %10 : vector<1x16x32xf32> to vector<16x32xf32>
    %12 = vector.shape_cast %9 : vector<16x32xf32> to vector<1x16x32xf32>
    tpu.vector_store %arg8[%c0_11, %c16, %c0_12], %12 {strides = array<i32>} : memref<4x48x32xf32, #tpu.memory_space<vmem>>, vector<1x16x32xf32>,
    %c0_13 = arith.constant 0 : index
    %c0_14 = arith.constant 0 : index
    %c0_15 = arith.constant 0 : index
    %13 = vector.load %arg3[%c0_13, %c0_14, %c0_15] : memref<4x16x16xf32, #tpu.memory_space<vmem>>, vector<1x16x16xf32>
    %14 = vector.shape_cast %13 : vector<1x16x16xf32> to vector<16x16xf32>
    %cst_16 = arith.constant dense<0.000000e+00> : vector<16x32xf32>
    %15 = tpu.matmul %14, %0, %cst_16 {dimension_numbers = #tpu.dot_dimension_numbers<[1], [0], [0], [1], [0, 0, 1, 1], [], []>} : vector<16x16xf32>, vector<16x32xf32>, vector<16x32xf32> -> vector<16x32xf32>
    %c0_17 = arith.constant 0 : index
    %c32 = arith.constant 32 : index
    %c0_18 = arith.constant 0 : index
    %16 = vector.load %arg8[%c0_17, %c32, %c0_18] : memref<4x48x32xf32, #tpu.memory_space<vmem>>, vector<1x16x32xf32>
    %17 = vector.shape_cast %16 : vector<1x16x32xf32> to vector<16x32xf32>
    %18 = vector.shape_cast %15 : vector<16x32xf32> to vector<1x16x32xf32>
    tpu.vector_store %arg8[%c0_17, %c32, %c0_18], %18 {strides = array<i32>} : memref<4x48x32xf32, #tpu.memory_space<vmem>>, vector<1x16x32xf32>,
    %c1 = arith.constant 1 : index
    %c0_19 = arith.constant 0 : index
    %c0_20 = arith.constant 0 : index
    %19 = vector.load %arg2[%c1, %c0_19, %c0_20] : memref<4x16x16xf32, #tpu.memory_space<vmem>>, vector<1x16x16xf32>
    %20 = vector.shape_cast %19 : vector<1x16x16xf32> to vector<16x16xf32>
    %cst_21 = arith.constant dense<0.000000e+00> : vector<16x32xf32>
    %21 = tpu.matmul %20, %0, %cst_21 {dimension_numbers = #tpu.dot_dimension_numbers<[1], [0], [0], [1], [0, 0, 1, 1], [], []>} : vector<16x16xf32>, vector<16x32xf32>, vector<16x32xf32> -> vector<16x32xf32>
    %c1_22 = arith.constant 1 : index
    %c0_23 = arith.constant 0 : index
    %c0_24 = arith.constant 0 : index
    %22 = vector.load %arg8[%c1_22, %c0_23, %c0_24] : memref<4x48x32xf32, #tpu.memory_space<vmem>>, vector<1x16x32xf32>
    %23 = vector.shape_cast %22 : vector<1x16x32xf32> to vector<16x32xf32>
    %24 = vector.shape_cast %21 : vector<16x32xf32> to vector<1x16x32xf32>
    tpu.vector_store %arg8[%c1_22, %c0_23, %c0_24], %24 {strides = array<i32>} : memref<4x48x32xf32, #tpu.memory_space<vmem>>, vector<1x16x32xf32>,
    %c1_25 = arith.constant 1 : index
    %c0_26 = arith.constant 0 : index
    %c0_27 = arith.constant 0 : index
    %25 = vector.load %arg1[%c1_25, %c0_26, %c0_27] : memref<4x16x16xf32, #tpu.memory_space<vmem>>, vector<1x16x16xf32>
    %26 = vector.shape_cast %25 : vector<1x16x16xf32> to vector<16x16xf32>
    %cst_28 = arith.constant dense<0.000000e+00> : vector<16x32xf32>
    %27 = tpu.matmul %26, %0, %cst_28 {dimension_numbers = #tpu.dot_dimension_numbers<[1], [0], [0], [1], [0, 0, 1, 1], [], []>} : vector<16x16xf32>, vector<16x32xf32>, vector<16x32xf32> -> vector<16x32xf32>
    %c1_29 = arith.constant 1 : index
    %c16_30 = arith.constant 16 : index
    %c0_31 = arith.constant 0 : index
    %28 = vector.load %arg8[%c1_29, %c16_30, %c0_31] : memref<4x48x32xf32, #tpu.memory_space<vmem>>, vector<1x16x32xf32>
    %29 = vector.shape_cast %28 : vector<1x16x32xf32> to vector<16x32xf32>
    %30 = vector.shape_cast %27 : vector<16x32xf32> to vector<1x16x32xf32>
    tpu.vector_store %arg8[%c1_29, %c16_30, %c0_31], %30 {strides = array<i32>} : memref<4x48x32xf32, #tpu.memory_space<vmem>>, vector<1x16x32xf32>,
    %c1_32 = arith.constant 1 : index
    %c0_33 = arith.constant 0 : index
    %c0_34 = arith.constant 0 : index
    %31 = vector.load %arg3[%c1_32, %c0_33, %c0_34] : memref<4x16x16xf32, #tpu.memory_space<vmem>>, vector<1x16x16xf32>
    %32 = vector.shape_cast %31 : vector<1x16x16xf32> to vector<16x16xf32>
    %cst_35 = arith.constant dense<0.000000e+00> : vector<16x32xf32>
    %33 = tpu.matmul %32, %0, %cst_35 {dimension_numbers = #tpu.dot_dimension_numbers<[1], [0], [0], [1], [0, 0, 1, 1], [], []>} : vector<16x16xf32>, vector<16x32xf32>, vector<16x32xf32> -> vector<16x32xf32>
    %c1_36 = arith.constant 1 : index
    %c32_37 = arith.constant 32 : index
    %c0_38 = arith.constant 0 : index
    %34 = vector.load %arg8[%c1_36, %c32_37, %c0_38] : memref<4x48x32xf32, #tpu.memory_space<vmem>>, vector<1x16x32xf32>
    %35 = vector.shape_cast %34 : vector<1x16x32xf32> to vector<16x32xf32>
    %36 = vector.shape_cast %33 : vector<16x32xf32> to vector<1x16x32xf32>
    tpu.vector_store %arg8[%c1_36, %c32_37, %c0_38], %36 {strides = array<i32>} : memref<4x48x32xf32, #tpu.memory_space<vmem>>, vector<1x16x32xf32>,
    %c2 = arith.constant 2 : index
    %c0_39 = arith.constant 0 : index
    %c0_40 = arith.constant 0 : index
    %37 = vector.load %arg2[%c2, %c0_39, %c0_40] : memref<4x16x16xf32, #tpu.memory_space<vmem>>, vector<1x16x16xf32>
    %38 = vector.shape_cast %37 : vector<1x16x16xf32> to vector<16x16xf32>
    %cst_41 = arith.constant dense<0.000000e+00> : vector<16x32xf32>
    %39 = tpu.matmul %38, %0, %cst_41 {dimension_numbers = #tpu.dot_dimension_numbers<[1], [0], [0], [1], [0, 0, 1, 1], [], []>} : vector<16x16xf32>, vector<16x32xf32>, vector<16x32xf32> -> vector<16x32xf32>
    %c2_42 = arith.constant 2 : index
    %c0_43 = arith.constant 0 : index
    %c0_44 = arith.constant 0 : index
    %40 = vector.load %arg8[%c2_42, %c0_43, %c0_44] : memref<4x48x32xf32, #tpu.memory_space<vmem>>, vector<1x16x32xf32>
    %41 = vector.shape_cast %40 : vector<1x16x32xf32> to vector<16x32xf32>
    %42 = vector.shape_cast %39 : vector<16x32xf32> to vector<1x16x32xf32>
    tpu.vector_store %arg8[%c2_42, %c0_43, %c0_44], %42 {strides = array<i32>} : memref<4x48x32xf32, #tpu.memory_space<vmem>>, vector<1x16x32xf32>,
    %c2_45 = arith.constant 2 : index
    %c0_46 = arith.constant 0 : index
    %c0_47 = arith.constant 0 : index
    %43 = vector.load %arg1[%c2_45, %c0_46, %c0_47] : memref<4x16x16xf32, #tpu.memory_space<vmem>>, vector<1x16x16xf32>
    %44 = vector.shape_cast %43 : vector<1x16x16xf32> to vector<16x16xf32>
    %cst_48 = arith.constant dense<0.000000e+00> : vector<16x32xf32>
    %45 = tpu.matmul %44, %0, %cst_48 {dimension_numbers = #tpu.dot_dimension_numbers<[1], [0], [0], [1], [0, 0, 1, 1], [], []>} : vector<16x16xf32>, vector<16x32xf32>, vector<16x32xf32> -> vector<16x32xf32>
    %c2_49 = arith.constant 2 : index
    %c16_50 = arith.constant 16 : index
    %c0_51 = arith.constant 0 : index
    %46 = vector.load %arg8[%c2_49, %c16_50, %c0_51] : memref<4x48x32xf32, #tpu.memory_space<vmem>>, vector<1x16x32xf32>
    %47 = vector.shape_cast %46 : vector<1x16x32xf32> to vector<16x32xf32>
    %48 = vector.shape_cast %45 : vector<16x32xf32> to vector<1x16x32xf32>
    tpu.vector_store %arg8[%c2_49, %c16_50, %c0_51], %48 {strides = array<i32>} : memref<4x48x32xf32, #tpu.memory_space<vmem>>, vector<1x16x32xf32>,
    %c2_52 = arith.constant 2 : index
    %c0_53 = arith.constant 0 : index
    %c0_54 = arith.constant 0 : index
    %49 = vector.load %arg3[%c2_52, %c0_53, %c0_54] : memref<4x16x16xf32, #tpu.memory_space<vmem>>, vector<1x16x16xf32>
    %50 = vector.shape_cast %49 : vector<1x16x16xf32> to vector<16x16xf32>
    %cst_55 = arith.constant dense<0.000000e+00> : vector<16x32xf32>
    %51 = tpu.matmul %50, %0, %cst_55 {dimension_numbers = #tpu.dot_dimension_numbers<[1], [0], [0], [1], [0, 0, 1, 1], [], []>} : vector<16x16xf32>, vector<16x32xf32>, vector<16x32xf32> -> vector<16x32xf32>
    %c2_56 = arith.constant 2 : index
    %c32_57 = arith.constant 32 : index
    %c0_58 = arith.constant 0 : index
    %52 = vector.load %arg8[%c2_56, %c32_57, %c0_58] : memref<4x48x32xf32, #tpu.memory_space<vmem>>, vector<1x16x32xf32>
    %53 = vector.shape_cast %52 : vector<1x16x32xf32> to vector<16x32xf32>
    %54 = vector.shape_cast %51 : vector<16x32xf32> to vector<1x16x32xf32>
    tpu.vector_store %arg8[%c2_56, %c32_57, %c0_58], %54 {strides = array<i32>} : memref<4x48x32xf32, #tpu.memory_space<vmem>>, vector<1x16x32xf32>,
    %c3 = arith.constant 3 : index
    %c0_59 = arith.constant 0 : index
    %c0_60 = arith.constant 0 : index
    %55 = vector.load %arg2[%c3, %c0_59, %c0_60] : memref<4x16x16xf32, #tpu.memory_space<vmem>>, vector<1x16x16xf32>
    %56 = vector.shape_cast %55 : vector<1x16x16xf32> to vector<16x16xf32>
    %cst_61 = arith.constant dense<0.000000e+00> : vector<16x32xf32>
    %57 = tpu.matmul %56, %0, %cst_61 {dimension_numbers = #tpu.dot_dimension_numbers<[1], [0], [0], [1], [0, 0, 1, 1], [], []>} : vector<16x16xf32>, vector<16x32xf32>, vector<16x32xf32> -> vector<16x32xf32>
    %c3_62 = arith.constant 3 : index
    %c0_63 = arith.constant 0 : index
    %c0_64 = arith.constant 0 : index
    %58 = vector.load %arg8[%c3_62, %c0_63, %c0_64] : memref<4x48x32xf32, #tpu.memory_space<vmem>>, vector<1x16x32xf32>
    %59 = vector.shape_cast %58 : vector<1x16x32xf32> to vector<16x32xf32>
    %60 = vector.shape_cast %57 : vector<16x32xf32> to vector<1x16x32xf32>
    tpu.vector_store %arg8[%c3_62, %c0_63, %c0_64], %60 {strides = array<i32>} : memref<4x48x32xf32, #tpu.memory_space<vmem>>, vector<1x16x32xf32>,
    %c3_65 = arith.constant 3 : index
    %c0_66 = arith.constant 0 : index
    %c0_67 = arith.constant 0 : index
    %61 = vector.load %arg1[%c3_65, %c0_66, %c0_67] : memref<4x16x16xf32, #tpu.memory_space<vmem>>, vector<1x16x16xf32>
    %62 = vector.shape_cast %61 : vector<1x16x16xf32> to vector<16x16xf32>
    %cst_68 = arith.constant dense<0.000000e+00> : vector<16x32xf32>
    %63 = tpu.matmul %62, %0, %cst_68 {dimension_numbers = #tpu.dot_dimension_numbers<[1], [0], [0], [1], [0, 0, 1, 1], [], []>} : vector<16x16xf32>, vector<16x32xf32>, vector<16x32xf32> -> vector<16x32xf32>
    %c3_69 = arith.constant 3 : index
    %c16_70 = arith.constant 16 : index
    %c0_71 = arith.constant 0 : index
    %64 = vector.load %arg8[%c3_69, %c16_70, %c0_71] : memref<4x48x32xf32, #tpu.memory_space<vmem>>, vector<1x16x32xf32>
    %65 = vector.shape_cast %64 : vector<1x16x32xf32> to vector<16x32xf32>
    %66 = vector.shape_cast %63 : vector<16x32xf32> to vector<1x16x32xf32>
    tpu.vector_store %arg8[%c3_69, %c16_70, %c0_71], %66 {strides = array<i32>} : memref<4x48x32xf32, #tpu.memory_space<vmem>>, vector<1x16x32xf32>,
    %c3_72 = arith.constant 3 : index
    %c0_73 = arith.constant 0 : index
    %c0_74 = arith.constant 0 : index
    %67 = vector.load %arg3[%c3_72, %c0_73, %c0_74] : memref<4x16x16xf32, #tpu.memory_space<vmem>>, vector<1x16x16xf32>
    %68 = vector.shape_cast %67 : vector<1x16x16xf32> to vector<16x16xf32>
    %cst_75 = arith.constant dense<0.000000e+00> : vector<16x32xf32>
    %69 = tpu.matmul %68, %0, %cst_75 {dimension_numbers = #tpu.dot_dimension_numbers<[1], [0], [0], [1], [0, 0, 1, 1], [], []>} : vector<16x16xf32>, vector<16x32xf32>, vector<16x32xf32> -> vector<16x32xf32>
    %c3_76 = arith.constant 3 : index
    %c32_77 = arith.constant 32 : index
    %c0_78 = arith.constant 0 : index
    %70 = vector.load %arg8[%c3_76, %c32_77, %c0_78] : memref<4x48x32xf32, #tpu.memory_space<vmem>>, vector<1x16x32xf32>
    %71 = vector.shape_cast %70 : vector<1x16x32xf32> to vector<16x32xf32>
    %72 = vector.shape_cast %69 : vector<16x32xf32> to vector<1x16x32xf32>
    tpu.vector_store %arg8[%c3_76, %c32_77, %c0_78], %72 {strides = array<i32>} : memref<4x48x32xf32, #tpu.memory_space<vmem>>, vector<1x16x32xf32>,
    %c0_79 = arith.constant 0 : index
    %c0_80 = arith.constant 0 : index
    %73 = vector.load %arg5[%c0_79, %c0_80] : memref<1x32xf32, #tpu.memory_space<vmem>>, vector<1x32xf32>
    %c16_i32 = arith.constant 16 : i32
    %74 = arith.muli %arg0, %c16_i32 : i32
    %75 = tpu.iota {dimensions = array<i32: 0>} : vector<16x1xi32>
    %76 = vector.broadcast %74 : i32 to vector<16x1xi32>
    %77 = arith.addi %76, %75 : vector<16x1xi32>
    %c2_i32 = arith.constant 2 : i32
    %78 = vector.broadcast %c2_i32 : i32 to vector<16x1xi32>
    %79 = arith.cmpi slt, %77, %78 : vector<16x1xi32>
    %80 = arith.extui %79 : vector<16x1xi1> to vector<16x1xi32>
    %81 = arith.sitofp %80 : vector<16x1xi32> to vector<16x1xf32>
    %c0_81 = arith.constant 0 : index
    %c0_82 = arith.constant 0 : index
    %c8 = arith.constant 8 : index
    %82 = vector.load %arg6[%c0_81, %c0_82, %c8] : memref<4x16x9xf32, #tpu.memory_space<vmem>>, vector<1x16x1xf32>
    %83 = vector.shape_cast %82 : vector<1x16x1xf32> to vector<16x1xf32>
    %c0_83 = arith.constant 0 : index
    %c16_84 = arith.constant 16 : index
    %c0_85 = arith.constant 0 : index
    %84 = vector.load %arg8[%c0_83, %c16_84, %c0_85] : memref<4x48x32xf32, #tpu.memory_space<vmem>>, vector<1x16x32xf32>
    %85 = vector.shape_cast %84 : vector<1x16x32xf32> to vector<16x32xf32>
    %86 = vector.broadcast %83 : vector<16x1xf32> to vector<16x32xf32>
    %87 = arith.mulf %86, %85 : vector<16x32xf32>
    %c0_86 = arith.constant 0 : index
    %c0_87 = arith.constant 0 : index
    %c0_88 = arith.constant 0 : index
    %88 = vector.load %arg6[%c0_86, %c0_87, %c0_88] : memref<4x16x9xf32, #tpu.memory_space<vmem>>, vector<1x16x1xf32>
    %89 = vector.shape_cast %88 : vector<1x16x1xf32> to vector<16x1xf32>
    %c0_89 = arith.constant 0 : index
    %c15 = arith.constant 15 : index
    %c0_90 = arith.constant 0 : index
    %90 = vector.load %arg8[%c0_89, %c15, %c0_90] : memref<4x48x32xf32, #tpu.memory_space<vmem>>, vector<1x16x32xf32>
    %91 = vector.shape_cast %90 : vector<1x16x32xf32> to vector<16x32xf32>
    %92 = vector.broadcast %89 : vector<16x1xf32> to vector<16x32xf32>
    %93 = arith.mulf %92, %91 : vector<16x32xf32>
    %94 = arith.addf %87, %93 : vector<16x32xf32>
    %c0_91 = arith.constant 0 : index
    %c0_92 = arith.constant 0 : index
    %c1_93 = arith.constant 1 : index
    %95 = vector.load %arg6[%c0_91, %c0_92, %c1_93] : memref<4x16x9xf32, #tpu.memory_space<vmem>>, vector<1x16x1xf32>
    %96 = vector.shape_cast %95 : vector<1x16x1xf32> to vector<16x1xf32>
    %c1_94 = arith.constant 1 : index
    %c15_95 = arith.constant 15 : index
    %c0_96 = arith.constant 0 : index
    %97 = vector.load %arg8[%c1_94, %c15_95, %c0_96] : memref<4x48x32xf32, #tpu.memory_space<vmem>>, vector<1x16x32xf32>
    %98 = vector.shape_cast %97 : vector<1x16x32xf32> to vector<16x32xf32>
    %99 = vector.broadcast %96 : vector<16x1xf32> to vector<16x32xf32>
    %100 = arith.mulf %99, %98 : vector<16x32xf32>
    %101 = arith.addf %94, %100 : vector<16x32xf32>
    %c0_97 = arith.constant 0 : index
    %c0_98 = arith.constant 0 : index
    %c2_99 = arith.constant 2 : index
    %102 = vector.load %arg6[%c0_97, %c0_98, %c2_99] : memref<4x16x9xf32, #tpu.memory_space<vmem>>, vector<1x16x1xf32>
    %103 = vector.shape_cast %102 : vector<1x16x1xf32> to vector<16x1xf32>
    %c2_100 = arith.constant 2 : index
    %c15_101 = arith.constant 15 : index
    %c0_102 = arith.constant 0 : index
    %104 = vector.load %arg8[%c2_100, %c15_101, %c0_102] : memref<4x48x32xf32, #tpu.memory_space<vmem>>, vector<1x16x32xf32>
    %105 = vector.shape_cast %104 : vector<1x16x32xf32> to vector<16x32xf32>
    %106 = vector.broadcast %103 : vector<16x1xf32> to vector<16x32xf32>
    %107 = arith.mulf %106, %105 : vector<16x32xf32>
    %108 = arith.addf %101, %107 : vector<16x32xf32>
    %c0_103 = arith.constant 0 : index
    %c0_104 = arith.constant 0 : index
    %c3_105 = arith.constant 3 : index
    %109 = vector.load %arg6[%c0_103, %c0_104, %c3_105] : memref<4x16x9xf32, #tpu.memory_space<vmem>>, vector<1x16x1xf32>
    %110 = vector.shape_cast %109 : vector<1x16x1xf32> to vector<16x1xf32>
    %c3_106 = arith.constant 3 : index
    %c15_107 = arith.constant 15 : index
    %c0_108 = arith.constant 0 : index
    %111 = vector.load %arg8[%c3_106, %c15_107, %c0_108] : memref<4x48x32xf32, #tpu.memory_space<vmem>>, vector<1x16x32xf32>
    %112 = vector.shape_cast %111 : vector<1x16x32xf32> to vector<16x32xf32>
    %113 = vector.broadcast %110 : vector<16x1xf32> to vector<16x32xf32>
    %114 = arith.mulf %113, %112 : vector<16x32xf32>
    %115 = arith.addf %108, %114 : vector<16x32xf32>
    %c0_109 = arith.constant 0 : index
    %c0_110 = arith.constant 0 : index
    %c4 = arith.constant 4 : index
    %116 = vector.load %arg6[%c0_109, %c0_110, %c4] : memref<4x16x9xf32, #tpu.memory_space<vmem>>, vector<1x16x1xf32>
    %117 = vector.shape_cast %116 : vector<1x16x1xf32> to vector<16x1xf32>
    %c0_111 = arith.constant 0 : index
    %c17 = arith.constant 17 : index
    %c0_112 = arith.constant 0 : index
    %118 = vector.load %arg8[%c0_111, %c17, %c0_112] : memref<4x48x32xf32, #tpu.memory_space<vmem>>, vector<1x16x32xf32>
    %119 = vector.shape_cast %118 : vector<1x16x32xf32> to vector<16x32xf32>
    %120 = vector.broadcast %117 : vector<16x1xf32> to vector<16x32xf32>
    %121 = arith.mulf %120, %119 : vector<16x32xf32>
    %122 = arith.addf %115, %121 : vector<16x32xf32>
    %c0_113 = arith.constant 0 : index
    %c0_114 = arith.constant 0 : index
    %c5 = arith.constant 5 : index
    %123 = vector.load %arg6[%c0_113, %c0_114, %c5] : memref<4x16x9xf32, #tpu.memory_space<vmem>>, vector<1x16x1xf32>
    %124 = vector.shape_cast %123 : vector<1x16x1xf32> to vector<16x1xf32>
    %c1_115 = arith.constant 1 : index
    %c17_116 = arith.constant 17 : index
    %c0_117 = arith.constant 0 : index
    %125 = vector.load %arg8[%c1_115, %c17_116, %c0_117] : memref<4x48x32xf32, #tpu.memory_space<vmem>>, vector<1x16x32xf32>
    %126 = vector.shape_cast %125 : vector<1x16x32xf32> to vector<16x32xf32>
    %127 = vector.broadcast %124 : vector<16x1xf32> to vector<16x32xf32>
    %128 = arith.mulf %127, %126 : vector<16x32xf32>
    %129 = arith.addf %122, %128 : vector<16x32xf32>
    %c0_118 = arith.constant 0 : index
    %c0_119 = arith.constant 0 : index
    %c6 = arith.constant 6 : index
    %130 = vector.load %arg6[%c0_118, %c0_119, %c6] : memref<4x16x9xf32, #tpu.memory_space<vmem>>, vector<1x16x1xf32>
    %131 = vector.shape_cast %130 : vector<1x16x1xf32> to vector<16x1xf32>
    %c2_120 = arith.constant 2 : index
    %c17_121 = arith.constant 17 : index
    %c0_122 = arith.constant 0 : index
    %132 = vector.load %arg8[%c2_120, %c17_121, %c0_122] : memref<4x48x32xf32, #tpu.memory_space<vmem>>, vector<1x16x32xf32>
    %133 = vector.shape_cast %132 : vector<1x16x32xf32> to vector<16x32xf32>
    %134 = vector.broadcast %131 : vector<16x1xf32> to vector<16x32xf32>
    %135 = arith.mulf %134, %133 : vector<16x32xf32>
    %136 = arith.addf %129, %135 : vector<16x32xf32>
    %c0_123 = arith.constant 0 : index
    %c0_124 = arith.constant 0 : index
    %c7 = arith.constant 7 : index
    %137 = vector.load %arg6[%c0_123, %c0_124, %c7] : memref<4x16x9xf32, #tpu.memory_space<vmem>>, vector<1x16x1xf32>
    %138 = vector.shape_cast %137 : vector<1x16x1xf32> to vector<16x1xf32>
    %c3_125 = arith.constant 3 : index
    %c17_126 = arith.constant 17 : index
    %c0_127 = arith.constant 0 : index
    %139 = vector.load %arg8[%c3_125, %c17_126, %c0_127] : memref<4x48x32xf32, #tpu.memory_space<vmem>>, vector<1x16x32xf32>
    %140 = vector.shape_cast %139 : vector<1x16x32xf32> to vector<16x32xf32>
    %141 = vector.broadcast %138 : vector<16x1xf32> to vector<16x32xf32>
    %142 = arith.mulf %141, %140 : vector<16x32xf32>
    %143 = arith.addf %136, %142 : vector<16x32xf32>
    %144 = vector.broadcast %73 : vector<1x32xf32> to vector<16x32xf32>
    %145 = arith.addf %143, %144 : vector<16x32xf32>
    %cst_128 = arith.constant 0.000000e+00 : f32
    %146 = vector.broadcast %cst_128 : f32 to vector<16x32xf32>
    %147 = arith.maximumf %145, %146 : vector<16x32xf32>
    %148 = vector.broadcast %81 : vector<16x1xf32> to vector<16x32xf32>
    %149 = arith.mulf %147, %148 : vector<16x32xf32>
    %c0_129 = arith.constant 0 : index
    %c0_130 = arith.constant 0 : index
    %c0_131 = arith.constant 0 : index
    %150 = vector.load %arg7[%c0_129, %c0_130, %c0_131] : memref<4x16x32xf32, #tpu.memory_space<vmem>>, vector<1x16x32xf32>
    %151 = vector.shape_cast %150 : vector<1x16x32xf32> to vector<16x32xf32>
    %152 = vector.shape_cast %149 : vector<16x32xf32> to vector<1x16x32xf32>
    tpu.vector_store %arg7[%c0_129, %c0_130, %c0_131], %152 {strides = array<i32>} : memref<4x16x32xf32, #tpu.memory_space<vmem>>, vector<1x16x32xf32>,
    %c1_132 = arith.constant 1 : index
    %c0_133 = arith.constant 0 : index
    %c8_134 = arith.constant 8 : index
    %153 = vector.load %arg6[%c1_132, %c0_133, %c8_134] : memref<4x16x9xf32, #tpu.memory_space<vmem>>, vector<1x16x1xf32>
    %154 = vector.shape_cast %153 : vector<1x16x1xf32> to vector<16x1xf32>
    %c1_135 = arith.constant 1 : index
    %c16_136 = arith.constant 16 : index
    %c0_137 = arith.constant 0 : index
    %155 = vector.load %arg8[%c1_135, %c16_136, %c0_137] : memref<4x48x32xf32, #tpu.memory_space<vmem>>, vector<1x16x32xf32>
    %156 = vector.shape_cast %155 : vector<1x16x32xf32> to vector<16x32xf32>
    %157 = vector.broadcast %154 : vector<16x1xf32> to vector<16x32xf32>
    %158 = arith.mulf %157, %156 : vector<16x32xf32>
    %c1_138 = arith.constant 1 : index
    %c0_139 = arith.constant 0 : index
    %c0_140 = arith.constant 0 : index
    %159 = vector.load %arg6[%c1_138, %c0_139, %c0_140] : memref<4x16x9xf32, #tpu.memory_space<vmem>>, vector<1x16x1xf32>
    %160 = vector.shape_cast %159 : vector<1x16x1xf32> to vector<16x1xf32>
    %c0_141 = arith.constant 0 : index
    %c15_142 = arith.constant 15 : index
    %c0_143 = arith.constant 0 : index
    %161 = vector.load %arg8[%c0_141, %c15_142, %c0_143] : memref<4x48x32xf32, #tpu.memory_space<vmem>>, vector<1x16x32xf32>
    %162 = vector.shape_cast %161 : vector<1x16x32xf32> to vector<16x32xf32>
    %163 = vector.broadcast %160 : vector<16x1xf32> to vector<16x32xf32>
    %164 = arith.mulf %163, %162 : vector<16x32xf32>
    %165 = arith.addf %158, %164 : vector<16x32xf32>
    %c1_144 = arith.constant 1 : index
    %c0_145 = arith.constant 0 : index
    %c1_146 = arith.constant 1 : index
    %166 = vector.load %arg6[%c1_144, %c0_145, %c1_146] : memref<4x16x9xf32, #tpu.memory_space<vmem>>, vector<1x16x1xf32>
    %167 = vector.shape_cast %166 : vector<1x16x1xf32> to vector<16x1xf32>
    %c1_147 = arith.constant 1 : index
    %c15_148 = arith.constant 15 : index
    %c0_149 = arith.constant 0 : index
    %168 = vector.load %arg8[%c1_147, %c15_148, %c0_149] : memref<4x48x32xf32, #tpu.memory_space<vmem>>, vector<1x16x32xf32>
    %169 = vector.shape_cast %168 : vector<1x16x32xf32> to vector<16x32xf32>
    %170 = vector.broadcast %167 : vector<16x1xf32> to vector<16x32xf32>
    %171 = arith.mulf %170, %169 : vector<16x32xf32>
    %172 = arith.addf %165, %171 : vector<16x32xf32>
    %c1_150 = arith.constant 1 : index
    %c0_151 = arith.constant 0 : index
    %c2_152 = arith.constant 2 : index
    %173 = vector.load %arg6[%c1_150, %c0_151, %c2_152] : memref<4x16x9xf32, #tpu.memory_space<vmem>>, vector<1x16x1xf32>
    %174 = vector.shape_cast %173 : vector<1x16x1xf32> to vector<16x1xf32>
    %c2_153 = arith.constant 2 : index
    %c15_154 = arith.constant 15 : index
    %c0_155 = arith.constant 0 : index
    %175 = vector.load %arg8[%c2_153, %c15_154, %c0_155] : memref<4x48x32xf32, #tpu.memory_space<vmem>>, vector<1x16x32xf32>
    %176 = vector.shape_cast %175 : vector<1x16x32xf32> to vector<16x32xf32>
    %177 = vector.broadcast %174 : vector<16x1xf32> to vector<16x32xf32>
    %178 = arith.mulf %177, %176 : vector<16x32xf32>
    %179 = arith.addf %172, %178 : vector<16x32xf32>
    %c1_156 = arith.constant 1 : index
    %c0_157 = arith.constant 0 : index
    %c3_158 = arith.constant 3 : index
    %180 = vector.load %arg6[%c1_156, %c0_157, %c3_158] : memref<4x16x9xf32, #tpu.memory_space<vmem>>, vector<1x16x1xf32>
    %181 = vector.shape_cast %180 : vector<1x16x1xf32> to vector<16x1xf32>
    %c3_159 = arith.constant 3 : index
    %c15_160 = arith.constant 15 : index
    %c0_161 = arith.constant 0 : index
    %182 = vector.load %arg8[%c3_159, %c15_160, %c0_161] : memref<4x48x32xf32, #tpu.memory_space<vmem>>, vector<1x16x32xf32>
    %183 = vector.shape_cast %182 : vector<1x16x32xf32> to vector<16x32xf32>
    %184 = vector.broadcast %181 : vector<16x1xf32> to vector<16x32xf32>
    %185 = arith.mulf %184, %183 : vector<16x32xf32>
    %186 = arith.addf %179, %185 : vector<16x32xf32>
    %c1_162 = arith.constant 1 : index
    %c0_163 = arith.constant 0 : index
    %c4_164 = arith.constant 4 : index
    %187 = vector.load %arg6[%c1_162, %c0_163, %c4_164] : memref<4x16x9xf32, #tpu.memory_space<vmem>>, vector<1x16x1xf32>
    %188 = vector.shape_cast %187 : vector<1x16x1xf32> to vector<16x1xf32>
    %c0_165 = arith.constant 0 : index
    %c17_166 = arith.constant 17 : index
    %c0_167 = arith.constant 0 : index
    %189 = vector.load %arg8[%c0_165, %c17_166, %c0_167] : memref<4x48x32xf32, #tpu.memory_space<vmem>>, vector<1x16x32xf32>
    %190 = vector.shape_cast %189 : vector<1x16x32xf32> to vector<16x32xf32>
    %191 = vector.broadcast %188 : vector<16x1xf32> to vector<16x32xf32>
    %192 = arith.mulf %191, %190 : vector<16x32xf32>
    %193 = arith.addf %186, %192 : vector<16x32xf32>
    %c1_168 = arith.constant 1 : index
    %c0_169 = arith.constant 0 : index
    %c5_170 = arith.constant 5 : index
    %194 = vector.load %arg6[%c1_168, %c0_169, %c5_170] : memref<4x16x9xf32, #tpu.memory_space<vmem>>, vector<1x16x1xf32>
    %195 = vector.shape_cast %194 : vector<1x16x1xf32> to vector<16x1xf32>
    %c1_171 = arith.constant 1 : index
    %c17_172 = arith.constant 17 : index
    %c0_173 = arith.constant 0 : index
    %196 = vector.load %arg8[%c1_171, %c17_172, %c0_173] : memref<4x48x32xf32, #tpu.memory_space<vmem>>, vector<1x16x32xf32>
    %197 = vector.shape_cast %196 : vector<1x16x32xf32> to vector<16x32xf32>
    %198 = vector.broadcast %195 : vector<16x1xf32> to vector<16x32xf32>
    %199 = arith.mulf %198, %197 : vector<16x32xf32>
    %200 = arith.addf %193, %199 : vector<16x32xf32>
    %c1_174 = arith.constant 1 : index
    %c0_175 = arith.constant 0 : index
    %c6_176 = arith.constant 6 : index
    %201 = vector.load %arg6[%c1_174, %c0_175, %c6_176] : memref<4x16x9xf32, #tpu.memory_space<vmem>>, vector<1x16x1xf32>
    %202 = vector.shape_cast %201 : vector<1x16x1xf32> to vector<16x1xf32>
    %c2_177 = arith.constant 2 : index
    %c17_178 = arith.constant 17 : index
    %c0_179 = arith.constant 0 : index
    %203 = vector.load %arg8[%c2_177, %c17_178, %c0_179] : memref<4x48x32xf32, #tpu.memory_space<vmem>>, vector<1x16x32xf32>
    %204 = vector.shape_cast %203 : vector<1x16x32xf32> to vector<16x32xf32>
    %205 = vector.broadcast %202 : vector<16x1xf32> to vector<16x32xf32>
    %206 = arith.mulf %205, %204 : vector<16x32xf32>
    %207 = arith.addf %200, %206 : vector<16x32xf32>
    %c1_180 = arith.constant 1 : index
    %c0_181 = arith.constant 0 : index
    %c7_182 = arith.constant 7 : index
    %208 = vector.load %arg6[%c1_180, %c0_181, %c7_182] : memref<4x16x9xf32, #tpu.memory_space<vmem>>, vector<1x16x1xf32>
    %209 = vector.shape_cast %208 : vector<1x16x1xf32> to vector<16x1xf32>
    %c3_183 = arith.constant 3 : index
    %c17_184 = arith.constant 17 : index
    %c0_185 = arith.constant 0 : index
    %210 = vector.load %arg8[%c3_183, %c17_184, %c0_185] : memref<4x48x32xf32, #tpu.memory_space<vmem>>, vector<1x16x32xf32>
    %211 = vector.shape_cast %210 : vector<1x16x32xf32> to vector<16x32xf32>
    %212 = vector.broadcast %209 : vector<16x1xf32> to vector<16x32xf32>
    %213 = arith.mulf %212, %211 : vector<16x32xf32>
    %214 = arith.addf %207, %213 : vector<16x32xf32>
    %215 = vector.broadcast %73 : vector<1x32xf32> to vector<16x32xf32>
    %216 = arith.addf %214, %215 : vector<16x32xf32>
    %cst_186 = arith.constant 0.000000e+00 : f32
    %217 = vector.broadcast %cst_186 : f32 to vector<16x32xf32>
    %218 = arith.maximumf %216, %217 : vector<16x32xf32>
    %219 = vector.broadcast %81 : vector<16x1xf32> to vector<16x32xf32>
    %220 = arith.mulf %218, %219 : vector<16x32xf32>
    %c1_187 = arith.constant 1 : index
    %c0_188 = arith.constant 0 : index
    %c0_189 = arith.constant 0 : index
    %221 = vector.load %arg7[%c1_187, %c0_188, %c0_189] : memref<4x16x32xf32, #tpu.memory_space<vmem>>, vector<1x16x32xf32>
    %222 = vector.shape_cast %221 : vector<1x16x32xf32> to vector<16x32xf32>
    %223 = vector.shape_cast %220 : vector<16x32xf32> to vector<1x16x32xf32>
    tpu.vector_store %arg7[%c1_187, %c0_188, %c0_189], %223 {strides = array<i32>} : memref<4x16x32xf32, #tpu.memory_space<vmem>>, vector<1x16x32xf32>,
    %c2_190 = arith.constant 2 : index
    %c0_191 = arith.constant 0 : index
    %c8_192 = arith.constant 8 : index
    %224 = vector.load %arg6[%c2_190, %c0_191, %c8_192] : memref<4x16x9xf32, #tpu.memory_space<vmem>>, vector<1x16x1xf32>
    %225 = vector.shape_cast %224 : vector<1x16x1xf32> to vector<16x1xf32>
    %c2_193 = arith.constant 2 : index
    %c16_194 = arith.constant 16 : index
    %c0_195 = arith.constant 0 : index
    %226 = vector.load %arg8[%c2_193, %c16_194, %c0_195] : memref<4x48x32xf32, #tpu.memory_space<vmem>>, vector<1x16x32xf32>
    %227 = vector.shape_cast %226 : vector<1x16x32xf32> to vector<16x32xf32>
    %228 = vector.broadcast %225 : vector<16x1xf32> to vector<16x32xf32>
    %229 = arith.mulf %228, %227 : vector<16x32xf32>
    %c2_196 = arith.constant 2 : index
    %c0_197 = arith.constant 0 : index
    %c0_198 = arith.constant 0 : index
    %230 = vector.load %arg6[%c2_196, %c0_197, %c0_198] : memref<4x16x9xf32, #tpu.memory_space<vmem>>, vector<1x16x1xf32>
    %231 = vector.shape_cast %230 : vector<1x16x1xf32> to vector<16x1xf32>
    %c0_199 = arith.constant 0 : index
    %c15_200 = arith.constant 15 : index
    %c0_201 = arith.constant 0 : index
    %232 = vector.load %arg8[%c0_199, %c15_200, %c0_201] : memref<4x48x32xf32, #tpu.memory_space<vmem>>, vector<1x16x32xf32>
    %233 = vector.shape_cast %232 : vector<1x16x32xf32> to vector<16x32xf32>
    %234 = vector.broadcast %231 : vector<16x1xf32> to vector<16x32xf32>
    %235 = arith.mulf %234, %233 : vector<16x32xf32>
    %236 = arith.addf %229, %235 : vector<16x32xf32>
    %c2_202 = arith.constant 2 : index
    %c0_203 = arith.constant 0 : index
    %c1_204 = arith.constant 1 : index
    %237 = vector.load %arg6[%c2_202, %c0_203, %c1_204] : memref<4x16x9xf32, #tpu.memory_space<vmem>>, vector<1x16x1xf32>
    %238 = vector.shape_cast %237 : vector<1x16x1xf32> to vector<16x1xf32>
    %c1_205 = arith.constant 1 : index
    %c15_206 = arith.constant 15 : index
    %c0_207 = arith.constant 0 : index
    %239 = vector.load %arg8[%c1_205, %c15_206, %c0_207] : memref<4x48x32xf32, #tpu.memory_space<vmem>>, vector<1x16x32xf32>
    %240 = vector.shape_cast %239 : vector<1x16x32xf32> to vector<16x32xf32>
    %241 = vector.broadcast %238 : vector<16x1xf32> to vector<16x32xf32>
    %242 = arith.mulf %241, %240 : vector<16x32xf32>
    %243 = arith.addf %236, %242 : vector<16x32xf32>
    %c2_208 = arith.constant 2 : index
    %c0_209 = arith.constant 0 : index
    %c2_210 = arith.constant 2 : index
    %244 = vector.load %arg6[%c2_208, %c0_209, %c2_210] : memref<4x16x9xf32, #tpu.memory_space<vmem>>, vector<1x16x1xf32>
    %245 = vector.shape_cast %244 : vector<1x16x1xf32> to vector<16x1xf32>
    %c2_211 = arith.constant 2 : index
    %c15_212 = arith.constant 15 : index
    %c0_213 = arith.constant 0 : index
    %246 = vector.load %arg8[%c2_211, %c15_212, %c0_213] : memref<4x48x32xf32, #tpu.memory_space<vmem>>, vector<1x16x32xf32>
    %247 = vector.shape_cast %246 : vector<1x16x32xf32> to vector<16x32xf32>
    %248 = vector.broadcast %245 : vector<16x1xf32> to vector<16x32xf32>
    %249 = arith.mulf %248, %247 : vector<16x32xf32>
    %250 = arith.addf %243, %249 : vector<16x32xf32>
    %c2_214 = arith.constant 2 : index
    %c0_215 = arith.constant 0 : index
    %c3_216 = arith.constant 3 : index
    %251 = vector.load %arg6[%c2_214, %c0_215, %c3_216] : memref<4x16x9xf32, #tpu.memory_space<vmem>>, vector<1x16x1xf32>
    %252 = vector.shape_cast %251 : vector<1x16x1xf32> to vector<16x1xf32>
    %c3_217 = arith.constant 3 : index
    %c15_218 = arith.constant 15 : index
    %c0_219 = arith.constant 0 : index
    %253 = vector.load %arg8[%c3_217, %c15_218, %c0_219] : memref<4x48x32xf32, #tpu.memory_space<vmem>>, vector<1x16x32xf32>
    %254 = vector.shape_cast %253 : vector<1x16x32xf32> to vector<16x32xf32>
    %255 = vector.broadcast %252 : vector<16x1xf32> to vector<16x32xf32>
    %256 = arith.mulf %255, %254 : vector<16x32xf32>
    %257 = arith.addf %250, %256 : vector<16x32xf32>
    %c2_220 = arith.constant 2 : index
    %c0_221 = arith.constant 0 : index
    %c4_222 = arith.constant 4 : index
    %258 = vector.load %arg6[%c2_220, %c0_221, %c4_222] : memref<4x16x9xf32, #tpu.memory_space<vmem>>, vector<1x16x1xf32>
    %259 = vector.shape_cast %258 : vector<1x16x1xf32> to vector<16x1xf32>
    %c0_223 = arith.constant 0 : index
    %c17_224 = arith.constant 17 : index
    %c0_225 = arith.constant 0 : index
    %260 = vector.load %arg8[%c0_223, %c17_224, %c0_225] : memref<4x48x32xf32, #tpu.memory_space<vmem>>, vector<1x16x32xf32>
    %261 = vector.shape_cast %260 : vector<1x16x32xf32> to vector<16x32xf32>
    %262 = vector.broadcast %259 : vector<16x1xf32> to vector<16x32xf32>
    %263 = arith.mulf %262, %261 : vector<16x32xf32>
    %264 = arith.addf %257, %263 : vector<16x32xf32>
    %c2_226 = arith.constant 2 : index
    %c0_227 = arith.constant 0 : index
    %c5_228 = arith.constant 5 : index
    %265 = vector.load %arg6[%c2_226, %c0_227, %c5_228] : memref<4x16x9xf32, #tpu.memory_space<vmem>>, vector<1x16x1xf32>
    %266 = vector.shape_cast %265 : vector<1x16x1xf32> to vector<16x1xf32>
    %c1_229 = arith.constant 1 : index
    %c17_230 = arith.constant 17 : index
    %c0_231 = arith.constant 0 : index
    %267 = vector.load %arg8[%c1_229, %c17_230, %c0_231] : memref<4x48x32xf32, #tpu.memory_space<vmem>>, vector<1x16x32xf32>
    %268 = vector.shape_cast %267 : vector<1x16x32xf32> to vector<16x32xf32>
    %269 = vector.broadcast %266 : vector<16x1xf32> to vector<16x32xf32>
    %270 = arith.mulf %269, %268 : vector<16x32xf32>
    %271 = arith.addf %264, %270 : vector<16x32xf32>
    %c2_232 = arith.constant 2 : index
    %c0_233 = arith.constant 0 : index
    %c6_234 = arith.constant 6 : index
    %272 = vector.load %arg6[%c2_232, %c0_233, %c6_234] : memref<4x16x9xf32, #tpu.memory_space<vmem>>, vector<1x16x1xf32>
    %273 = vector.shape_cast %272 : vector<1x16x1xf32> to vector<16x1xf32>
    %c2_235 = arith.constant 2 : index
    %c17_236 = arith.constant 17 : index
    %c0_237 = arith.constant 0 : index
    %274 = vector.load %arg8[%c2_235, %c17_236, %c0_237] : memref<4x48x32xf32, #tpu.memory_space<vmem>>, vector<1x16x32xf32>
    %275 = vector.shape_cast %274 : vector<1x16x32xf32> to vector<16x32xf32>
    %276 = vector.broadcast %273 : vector<16x1xf32> to vector<16x32xf32>
    %277 = arith.mulf %276, %275 : vector<16x32xf32>
    %278 = arith.addf %271, %277 : vector<16x32xf32>
    %c2_238 = arith.constant 2 : index
    %c0_239 = arith.constant 0 : index
    %c7_240 = arith.constant 7 : index
    %279 = vector.load %arg6[%c2_238, %c0_239, %c7_240] : memref<4x16x9xf32, #tpu.memory_space<vmem>>, vector<1x16x1xf32>
    %280 = vector.shape_cast %279 : vector<1x16x1xf32> to vector<16x1xf32>
    %c3_241 = arith.constant 3 : index
    %c17_242 = arith.constant 17 : index
    %c0_243 = arith.constant 0 : index
    %281 = vector.load %arg8[%c3_241, %c17_242, %c0_243] : memref<4x48x32xf32, #tpu.memory_space<vmem>>, vector<1x16x32xf32>
    %282 = vector.shape_cast %281 : vector<1x16x32xf32> to vector<16x32xf32>
    %283 = vector.broadcast %280 : vector<16x1xf32> to vector<16x32xf32>
    %284 = arith.mulf %283, %282 : vector<16x32xf32>
    %285 = arith.addf %278, %284 : vector<16x32xf32>
    %286 = vector.broadcast %73 : vector<1x32xf32> to vector<16x32xf32>
    %287 = arith.addf %285, %286 : vector<16x32xf32>
    %cst_244 = arith.constant 0.000000e+00 : f32
    %288 = vector.broadcast %cst_244 : f32 to vector<16x32xf32>
    %289 = arith.maximumf %287, %288 : vector<16x32xf32>
    %290 = vector.broadcast %81 : vector<16x1xf32> to vector<16x32xf32>
    %291 = arith.mulf %289, %290 : vector<16x32xf32>
    %c2_245 = arith.constant 2 : index
    %c0_246 = arith.constant 0 : index
    %c0_247 = arith.constant 0 : index
    %292 = vector.load %arg7[%c2_245, %c0_246, %c0_247] : memref<4x16x32xf32, #tpu.memory_space<vmem>>, vector<1x16x32xf32>
    %293 = vector.shape_cast %292 : vector<1x16x32xf32> to vector<16x32xf32>
    %294 = vector.shape_cast %291 : vector<16x32xf32> to vector<1x16x32xf32>
    tpu.vector_store %arg7[%c2_245, %c0_246, %c0_247], %294 {strides = array<i32>} : memref<4x16x32xf32, #tpu.memory_space<vmem>>, vector<1x16x32xf32>,
    %c3_248 = arith.constant 3 : index
    %c0_249 = arith.constant 0 : index
    %c8_250 = arith.constant 8 : index
    %295 = vector.load %arg6[%c3_248, %c0_249, %c8_250] : memref<4x16x9xf32, #tpu.memory_space<vmem>>, vector<1x16x1xf32>
    %296 = vector.shape_cast %295 : vector<1x16x1xf32> to vector<16x1xf32>
    %c3_251 = arith.constant 3 : index
    %c16_252 = arith.constant 16 : index
    %c0_253 = arith.constant 0 : index
    %297 = vector.load %arg8[%c3_251, %c16_252, %c0_253] : memref<4x48x32xf32, #tpu.memory_space<vmem>>, vector<1x16x32xf32>
    %298 = vector.shape_cast %297 : vector<1x16x32xf32> to vector<16x32xf32>
    %299 = vector.broadcast %296 : vector<16x1xf32> to vector<16x32xf32>
    %300 = arith.mulf %299, %298 : vector<16x32xf32>
    %c3_254 = arith.constant 3 : index
    %c0_255 = arith.constant 0 : index
    %c0_256 = arith.constant 0 : index
    %301 = vector.load %arg6[%c3_254, %c0_255, %c0_256] : memref<4x16x9xf32, #tpu.memory_space<vmem>>, vector<1x16x1xf32>
    %302 = vector.shape_cast %301 : vector<1x16x1xf32> to vector<16x1xf32>
    %c0_257 = arith.constant 0 : index
    %c15_258 = arith.constant 15 : index
    %c0_259 = arith.constant 0 : index
    %303 = vector.load %arg8[%c0_257, %c15_258, %c0_259] : memref<4x48x32xf32, #tpu.memory_space<vmem>>, vector<1x16x32xf32>
    %304 = vector.shape_cast %303 : vector<1x16x32xf32> to vector<16x32xf32>
    %305 = vector.broadcast %302 : vector<16x1xf32> to vector<16x32xf32>
    %306 = arith.mulf %305, %304 : vector<16x32xf32>
    %307 = arith.addf %300, %306 : vector<16x32xf32>
    %c3_260 = arith.constant 3 : index
    %c0_261 = arith.constant 0 : index
    %c1_262 = arith.constant 1 : index
    %308 = vector.load %arg6[%c3_260, %c0_261, %c1_262] : memref<4x16x9xf32, #tpu.memory_space<vmem>>, vector<1x16x1xf32>
    %309 = vector.shape_cast %308 : vector<1x16x1xf32> to vector<16x1xf32>
    %c1_263 = arith.constant 1 : index
    %c15_264 = arith.constant 15 : index
    %c0_265 = arith.constant 0 : index
    %310 = vector.load %arg8[%c1_263, %c15_264, %c0_265] : memref<4x48x32xf32, #tpu.memory_space<vmem>>, vector<1x16x32xf32>
    %311 = vector.shape_cast %310 : vector<1x16x32xf32> to vector<16x32xf32>
    %312 = vector.broadcast %309 : vector<16x1xf32> to vector<16x32xf32>
    %313 = arith.mulf %312, %311 : vector<16x32xf32>
    %314 = arith.addf %307, %313 : vector<16x32xf32>
    %c3_266 = arith.constant 3 : index
    %c0_267 = arith.constant 0 : index
    %c2_268 = arith.constant 2 : index
    %315 = vector.load %arg6[%c3_266, %c0_267, %c2_268] : memref<4x16x9xf32, #tpu.memory_space<vmem>>, vector<1x16x1xf32>
    %316 = vector.shape_cast %315 : vector<1x16x1xf32> to vector<16x1xf32>
    %c2_269 = arith.constant 2 : index
    %c15_270 = arith.constant 15 : index
    %c0_271 = arith.constant 0 : index
    %317 = vector.load %arg8[%c2_269, %c15_270, %c0_271] : memref<4x48x32xf32, #tpu.memory_space<vmem>>, vector<1x16x32xf32>
    %318 = vector.shape_cast %317 : vector<1x16x32xf32> to vector<16x32xf32>
    %319 = vector.broadcast %316 : vector<16x1xf32> to vector<16x32xf32>
    %320 = arith.mulf %319, %318 : vector<16x32xf32>
    %321 = arith.addf %314, %320 : vector<16x32xf32>
    %c3_272 = arith.constant 3 : index
    %c0_273 = arith.constant 0 : index
    %c3_274 = arith.constant 3 : index
    %322 = vector.load %arg6[%c3_272, %c0_273, %c3_274] : memref<4x16x9xf32, #tpu.memory_space<vmem>>, vector<1x16x1xf32>
    %323 = vector.shape_cast %322 : vector<1x16x1xf32> to vector<16x1xf32>
    %c3_275 = arith.constant 3 : index
    %c15_276 = arith.constant 15 : index
    %c0_277 = arith.constant 0 : index
    %324 = vector.load %arg8[%c3_275, %c15_276, %c0_277] : memref<4x48x32xf32, #tpu.memory_space<vmem>>, vector<1x16x32xf32>
    %325 = vector.shape_cast %324 : vector<1x16x32xf32> to vector<16x32xf32>
    %326 = vector.broadcast %323 : vector<16x1xf32> to vector<16x32xf32>
    %327 = arith.mulf %326, %325 : vector<16x32xf32>
    %328 = arith.addf %321, %327 : vector<16x32xf32>
    %c3_278 = arith.constant 3 : index
    %c0_279 = arith.constant 0 : index
    %c4_280 = arith.constant 4 : index
    %329 = vector.load %arg6[%c3_278, %c0_279, %c4_280] : memref<4x16x9xf32, #tpu.memory_space<vmem>>, vector<1x16x1xf32>
    %330 = vector.shape_cast %329 : vector<1x16x1xf32> to vector<16x1xf32>
    %c0_281 = arith.constant 0 : index
    %c17_282 = arith.constant 17 : index
    %c0_283 = arith.constant 0 : index
    %331 = vector.load %arg8[%c0_281, %c17_282, %c0_283] : memref<4x48x32xf32, #tpu.memory_space<vmem>>, vector<1x16x32xf32>
    %332 = vector.shape_cast %331 : vector<1x16x32xf32> to vector<16x32xf32>
    %333 = vector.broadcast %330 : vector<16x1xf32> to vector<16x32xf32>
    %334 = arith.mulf %333, %332 : vector<16x32xf32>
    %335 = arith.addf %328, %334 : vector<16x32xf32>
    %c3_284 = arith.constant 3 : index
    %c0_285 = arith.constant 0 : index
    %c5_286 = arith.constant 5 : index
    %336 = vector.load %arg6[%c3_284, %c0_285, %c5_286] : memref<4x16x9xf32, #tpu.memory_space<vmem>>, vector<1x16x1xf32>
    %337 = vector.shape_cast %336 : vector<1x16x1xf32> to vector<16x1xf32>
    %c1_287 = arith.constant 1 : index
    %c17_288 = arith.constant 17 : index
    %c0_289 = arith.constant 0 : index
    %338 = vector.load %arg8[%c1_287, %c17_288, %c0_289] : memref<4x48x32xf32, #tpu.memory_space<vmem>>, vector<1x16x32xf32>
    %339 = vector.shape_cast %338 : vector<1x16x32xf32> to vector<16x32xf32>
    %340 = vector.broadcast %337 : vector<16x1xf32> to vector<16x32xf32>
    %341 = arith.mulf %340, %339 : vector<16x32xf32>
    %342 = arith.addf %335, %341 : vector<16x32xf32>
    %c3_290 = arith.constant 3 : index
    %c0_291 = arith.constant 0 : index
    %c6_292 = arith.constant 6 : index
    %343 = vector.load %arg6[%c3_290, %c0_291, %c6_292] : memref<4x16x9xf32, #tpu.memory_space<vmem>>, vector<1x16x1xf32>
    %344 = vector.shape_cast %343 : vector<1x16x1xf32> to vector<16x1xf32>
    %c2_293 = arith.constant 2 : index
    %c17_294 = arith.constant 17 : index
    %c0_295 = arith.constant 0 : index
    %345 = vector.load %arg8[%c2_293, %c17_294, %c0_295] : memref<4x48x32xf32, #tpu.memory_space<vmem>>, vector<1x16x32xf32>
    %346 = vector.shape_cast %345 : vector<1x16x32xf32> to vector<16x32xf32>
    %347 = vector.broadcast %344 : vector<16x1xf32> to vector<16x32xf32>
    %348 = arith.mulf %347, %346 : vector<16x32xf32>
    %349 = arith.addf %342, %348 : vector<16x32xf32>
    %c3_296 = arith.constant 3 : index
    %c0_297 = arith.constant 0 : index
    %c7_298 = arith.constant 7 : index
    %350 = vector.load %arg6[%c3_296, %c0_297, %c7_298] : memref<4x16x9xf32, #tpu.memory_space<vmem>>, vector<1x16x1xf32>
    %351 = vector.shape_cast %350 : vector<1x16x1xf32> to vector<16x1xf32>
    %c3_299 = arith.constant 3 : index
    %c17_300 = arith.constant 17 : index
    %c0_301 = arith.constant 0 : index
    %352 = vector.load %arg8[%c3_299, %c17_300, %c0_301] : memref<4x48x32xf32, #tpu.memory_space<vmem>>, vector<1x16x32xf32>
    %353 = vector.shape_cast %352 : vector<1x16x32xf32> to vector<16x32xf32>
    %354 = vector.broadcast %351 : vector<16x1xf32> to vector<16x32xf32>
    %355 = arith.mulf %354, %353 : vector<16x32xf32>
    %356 = arith.addf %349, %355 : vector<16x32xf32>
    %357 = vector.broadcast %73 : vector<1x32xf32> to vector<16x32xf32>
    %358 = arith.addf %356, %357 : vector<16x32xf32>
    %cst_302 = arith.constant 0.000000e+00 : f32
    %359 = vector.broadcast %cst_302 : f32 to vector<16x32xf32>
    %360 = arith.maximumf %358, %359 : vector<16x32xf32>
    %361 = vector.broadcast %81 : vector<16x1xf32> to vector<16x32xf32>
    %362 = arith.mulf %360, %361 : vector<16x32xf32>
    %c3_303 = arith.constant 3 : index
    %c0_304 = arith.constant 0 : index
    %c0_305 = arith.constant 0 : index
    %363 = vector.load %arg7[%c3_303, %c0_304, %c0_305] : memref<4x16x32xf32, #tpu.memory_space<vmem>>, vector<1x16x32xf32>
    %364 = vector.shape_cast %363 : vector<1x16x32xf32> to vector<16x32xf32>
    %365 = vector.shape_cast %362 : vector<16x32xf32> to vector<1x16x32xf32>
    tpu.vector_store %arg7[%c3_303, %c0_304, %c0_305], %365 {strides = array<i32>} : memref<4x16x32xf32, #tpu.memory_space<vmem>>, vector<1x16x32xf32>,
    return
  }
  func.func @transform_0(%arg0: i32) -> (i32, i32, i32) {
    %c0_i32 = arith.constant 0 : i32
    %c0_i32_0 = arith.constant 0 : i32
    %c0_i32_1 = arith.constant 0 : i32
    return %c0_i32, %arg0, %c0_i32_0 : i32, i32, i32
  }
  func.func @transform_1(%arg0: i32) -> (i32, i32, i32) {
    %c0_i32 = arith.constant 0 : i32
    %c0_i32_0 = arith.constant 0 : i32
    %c0_i32_1 = arith.constant 0 : i32
    return %c0_i32, %arg0, %c0_i32_0 : i32, i32, i32
  }
  func.func @transform_2(%arg0: i32) -> (i32, i32, i32) {
    %c0_i32 = arith.constant 0 : i32
    %c0_i32_0 = arith.constant 0 : i32
    %c0_i32_1 = arith.constant 0 : i32
    return %c0_i32, %arg0, %c0_i32_0 : i32, i32, i32
  }
  func.func @transform_3(%arg0: i32) -> (i32, i32) {
    %c0_i32 = arith.constant 0 : i32
    %c0_i32_0 = arith.constant 0 : i32
    %c0_i32_1 = arith.constant 0 : i32
    return %c0_i32, %c0_i32_0 : i32, i32
  }
  func.func @transform_4(%arg0: i32) -> (i32, i32) {
    %c0_i32 = arith.constant 0 : i32
    %c0_i32_0 = arith.constant 0 : i32
    %c0_i32_1 = arith.constant 0 : i32
    return %c0_i32, %c0_i32_0 : i32, i32
  }
  func.func @transform_5(%arg0: i32) -> (i32, i32, i32) {
    %c0_i32 = arith.constant 0 : i32
    %c0_i32_0 = arith.constant 0 : i32
    %c0_i32_1 = arith.constant 0 : i32
    return %c0_i32, %arg0, %c0_i32_0 : i32, i32, i32
  }
  func.func @transform_6(%arg0: i32) -> (i32, i32, i32) {
    %c0_i32 = arith.constant 0 : i32
    %c0_i32_0 = arith.constant 0 : i32
    %c0_i32_1 = arith.constant 0 : i32
    return %c0_i32, %arg0, %c0_i32_0 : i32, i32, i32
  }
}

</mosaic_0001>

<bundles_post_ra>
// kernel: tpu_custom_call.1
= control target key start
LH: loop header
LB: loop body
LE: loop exit
PB: predicated region body
PF: predicated region fallthrough
CT: control target
= control target key end

     0   :  { %11 = vsyncpa [#allocation4], 0  ;;  %s2626_s0 = inlined_call_operand.vmem [shape: f32[4,16,16], index: 0, kind: input, shape index: {}]   ;;  %s2627_s1 = inlined_call_operand.hbm [shape: f32[4,16,16], index: 1, kind: input, shape index: {}]   ;;  %s2628_s2 = inlined_call_operand.hbm [shape: f32[4,16,16], index: 2, kind: input, shape index: {}]   ;;  %s2629_s3 = inlined_call_operand.vmem [shape: f32[16,32], index: 3, kind: input, shape index: {}]   ;;  %s2630_s4 = inlined_call_operand.vmem [shape: f32[1,32], index: 4, kind: input, shape index: {}]   ;;  %s2631_s5 = inlined_call_operand.vmem [shape: f32[4,16,9], index: 5, kind: input, shape index: {}]   ;;  %s2632_s6 = inlined_call_operand.hbm [shape: f32[4,16,32], index: 6, kind: output, shape index: {}]  }
   0x1   :  { %12 = vsyncpa [#allocation7], 0 }
   0x2   :  { %13 = vsyncpa [#allocation5], 0  ;;  %s2023_s21 = smov [#allocation3]   ;;  %s1951_s25 = scalar_lea.hbm %s2627_s1, 1024 }
   0x3   :  { %s21_s22 = sshll.u32 %s2023_s21, 4  ;;  %p1952_p0 = scmp.ne.s32.totalorder %s2627_s1, %s1951_s25  ;;  %s22_s22 = int_to_ptr.vmem [resolvable:$true] %s21_s22 }
   0x4   :  { %p1955_p1 = scmp.lt.u32.totalorder %s1951_s25, %s2627_s1 }
   0x6   :  { %p1957_p2 = pnand %p1955_p1, %p1952_p0 }
   0x8   :  { %1960 = shalt.err (!%p1957_p2)
}
   0x9   :  { %s1961_s30 = scalar_lea.vmem %s22_s22, 1024  ;;  %p1966_p4 = scmp.lt.s32.totalorder %s22_s22, %s22_s22 }
   0xa   :  { %p1962_p3 = scmp.ne.s32.totalorder %s22_s22, %s1961_s30  ;;  %p1967_p5 = scmp.lt.s32.totalorder %s1961_s30, %s1961_s30 }
   0xc   :  { %p1968_p6 = por %p1967_p5, %p1966_p4 }
   0xe   :  { %p1969_p7 = pnand %p1968_p6, %p1962_p3 }
  0x10   :  { %1972 = shalt.err (!%p1969_p7)
}
  0x11   :  { %s2024_s7 = smov 128   ;;  %s2025_s8 = smov 8  }
  0x12   :  { %27 = dma.hbm_to_vmem [thread:$0]  %s2627_s1, 1024, %s22_s22, [#allocation4], %s2024_s7, %s2024_s7, %s2025_s8  }
  0x13   :  { %s2026_s11 = smov [#allocation6]   ;;  %s1973_s15 = scalar_lea.hbm %s2628_s2, 1024 }
  0x14   :  { %s33_s12 = sshll.u32 %s2026_s11, 4  ;;  %p1974_p8 = scmp.ne.s32.totalorder %s2628_s2, %s1973_s15  ;;  %s34_s12 = int_to_ptr.vmem [resolvable:$true] %s33_s12 }
  0x15   :  { %p1977_p9 = scmp.lt.u32.totalorder %s1973_s15, %s2628_s2 }
  0x17   :  { %p1979_p10 = pnand %p1977_p9, %p1974_p8 }
  0x19   :  { %1982 = shalt.err (!%p1979_p10)
}
  0x1a   :  { %s1983_s20 = scalar_lea.vmem %s34_s12, 1024  ;;  %p1988_p12 = scmp.lt.s32.totalorder %s34_s12, %s34_s12 }
  0x1b   :  { %p1984_p11 = scmp.ne.s32.totalorder %s34_s12, %s1983_s20  ;;  %p1989_p13 = scmp.lt.s32.totalorder %s1983_s20, %s1983_s20 }
  0x1d   :  { %p1990_p0 = por %p1989_p13, %p1988_p12 }
  0x1f   :  { %p1991_p1 = pnand %p1990_p0, %p1984_p11 }
  0x21   :  { %1994 = shalt.err (!%p1991_p1)
}
  0x22   :  { %39 = dma.hbm_to_vmem [thread:$0]  %s2628_s2, 1024, %s34_s12, [#allocation7], %s2024_s7, %s2024_s7, %s2025_s8  }
  0x23   :  { %2017 = dma.done.wait [#allocation4], 1024  }
  0x24   :  { %2018 = vsyncadd [#allocation4], 4294966272 }
  0x25   :  { %2019 = dma.done.wait [#allocation7], 1024  }
  0x26   :  { %2020 = vsyncadd [#allocation7], 4294966272  ;;  %v2027_v0 = vmov 0   ;;  %v2028_v1 = vmov 8   ;;  %vm56_vm0 = vcmask 130048   ;;  %v2108_v2 = vld [vmem:[%s2631_s5] sm:$0xff] }
  0x27   :  { %1910 = vset.pattern.permute.xlu1 %v2027_v0  ;;  %1909 = vset.pattern.permute.xlu0 %v2028_v1  ;;  %v52_v3 = vld [vmem:[%s2629_s3] sm:$0xff]  ;;  %v53_v4 = vld [vmem:[%s2629_s3 + $0x8] sm:$0xff]  ;;  %v312_v12 = vld [vmem:[#allocation3 + $0x10] sm:$0xff]  ;;  %v2029_v15 = vmov 1   ;;  %v2030_v20 = vmov 2   ;;  %v2031_v25 = vmov 3  }
  0x28   :  { %1121 = vperm.xlu1 %1910, %v2108_v2   ;;  %v2117_v5 = vpack.c.bf16 %v53_v4, %v52_v3  ;;  %v54_v6 = vld [vmem:[#allocation3] sm:$0xff]  ;;  %1108 = vperm.xlu0 %1909, %v2108_v2   ;;  %v2126_v8 = vld [vmem:[%s2631_s5 + $0x8] sm:$0xff]  ;;  %v313_v14 = vld [vmem:[#allocation3 + $0x18] sm:$0xff]  ;;  %v2032_v36 = vmov 4   ;;  %v2033_v37 = vmov 5   ;;  %v2034_v38 = vmov 6  }
  0x29   :  { %v141_v7 = vld [vmem:[%s2626_s0] sm:$0xff]  ;;  %1766 = vmatprep.mubr.msk.f32.mxu0 %vm56_vm0, %v54_v6  ;;  %v55_v9 = vld [vmem:[#allocation3 + $0x8] sm:$0xff]  ;;  %v1684_v16 = vld [vmem:[%s2626_s0 + $0x10] sm:$0xff]  ;;  %v2035_v39 = vmov 7   ;;  %vm138_vm1 = vcmask 261120  }
  0x2a   :  { %1773 = vmatprep.mubr.msk.f32.mxu1 %vm56_vm0, %v141_v7  ;;  %1847 = vmatprep.subr.bf16.mxu0 %v2117_v5  ;;  %v142_v10 = vld [vmem:[%s2626_s0 + $0x8] sm:$0xff]  ;;  %v226_v11 = vld [vmem:[#allocation6] sm:$0xff]  ;;  %v485_v17 = vld [vmem:[#allocation6 + $0x10] sm:$0xff] }
  0x2b   :  { %1851 = vmatprep.subr.bf16.mxu1 %v2117_v5  ;;  %1849 = vmatpush3.bf16.msra.mxu0 %v2117_v5  ;;  %v227_v13 = vld [vmem:[#allocation6 + $0x8] sm:$0xff]  ;;  %v1685_v18 = vld [vmem:[%s2626_s0 + $0x18] sm:$0xff]  ;;  %v571_v21 = vld [vmem:[#allocation3 + $0x20] sm:$0xff] }
  0x2c   :  { %1853 = vmatpush3.bf16.msra.mxu1 %v2117_v5  ;;  %1125 = vperm.xlu1 %1910, %v2126_v8   ;;  %v486_v19 = vld [vmem:[#allocation6 + $0x18] sm:$0xff]  ;;  %v1692_v22 = vld [vmem:[%s2626_s0 + $0x20] sm:$0xff]  ;;  %v572_v23 = vld [vmem:[#allocation3 + $0x28] sm:$0xff] }
  0x2d   :  { %1855 = vmatprep.subr.bf16.mxu0 %v2117_v5  ;;  %1859 = vmatprep.subr.bf16.mxu1 %v2117_v5  ;;  %v1693_v24 = vld [vmem:[%s2626_s0 + $0x28] sm:$0xff]  ;;  %v744_v26 = vld [vmem:[#allocation6 + $0x20] sm:$0xff]  ;;  %v830_v27 = vld [vmem:[#allocation3 + $0x30] sm:$0xff] }
  0x2e   :  { %1113 = vperm.xlu0 %1909, %v2126_v8   ;;  %1767 = vmatmul.mubr.msk.f32.vlgmr.msra.gmra.mrb[0].mxu0 %vm56_vm0, %v55_v9  ;;  %v745_v28 = vld [vmem:[#allocation6 + $0x28] sm:$0xff]  ;;  %v831_v29 = vld [vmem:[#allocation3 + $0x38] sm:$0xff]  ;;  %v1700_v30 = vld [vmem:[%s2626_s0 + $0x30] sm:$0xff] }
  0x2f   :  { %1774 = vmatmul.mubr.msk.f32.vlgmr.msra.gmra.mrb[0].mxu1 %vm56_vm0, %v142_v10  ;;  %1857 = vmatpush3.bf16.msra.mxu0 %v2117_v5  ;;  %v1003_v31 = vld [vmem:[#allocation6 + $0x30] sm:$0xff]  ;;  %v2199_v32 = vld [vmem:[%s2631_s5 + $0x18] sm:$0xff]  ;;  %v2214_v35 = vld [vmem:[%s2631_s5 + $0x28] sm:$0xff] }
  0x30   :  { %1861 = vmatpush3.bf16.msra.mxu1 %v2117_v5  ;;  %1911 = vset.pattern.permute.xlu1 %v2029_v15  ;;  %v1701_v33 = vld [vmem:[%s2626_s0 + $0x38] sm:$0xff]  ;;  %v1708_v40 = vld [vmem:[%s2631_s5 + $0x10] sm:$0xff]  ;;  %v2256_v42 = vld [vmem:[%s2631_s5 + $0x20] sm:$0xff] }
  0x31   :  { %1780 = vmatprep.mubr.msk.f32.mxu0 %vm56_vm0, %v226_v11  ;;  %1139 = vperm.xlu1 %1911, %v2126_v8   ;;  %v1004_v34 = vld [vmem:[#allocation6 + $0x38] sm:$0xff]  ;;  %v2243_v41 = vld [vmem:[%s2631_s5 + $0x30] sm:$0xff] }
  0x32   :  { %1787 = vmatprep.mubr.msk.f32.mxu1 %vm56_vm0, %v312_v12  ;;  %1781 = vmatmul.mubr.msk.f32.vlgmr.msra.gmra.mrb[2].mxu0 %vm56_vm0, %v227_v13  ;;  %v2262_v43 = vld [vmem:[%s2631_s5 + $0x38] sm:$0xff] }
  0x33   :  { %1788 = vmatmul.mubr.msk.f32.vlgmr.msra.gmra.mrb[2].mxu1 %vm56_vm0, %v313_v14  ;;  %1863 = vmatprep.subr.bf16.mxu0 %v2117_v5 }
  0x34   :  { %1867 = vmatprep.subr.bf16.mxu1 %v2117_v5  ;;  %1865 = vmatpush3.bf16.msra.mxu0 %v2117_v5 }
  0x35   :  { %1869 = vmatpush3.bf16.msra.mxu1 %v2117_v5  ;;  %1912 = vset.pattern.permute.xlu1 %v2030_v20 }
  0x36   :  { %1794 = vmatprep.mubr.msk.f32.mxu0 %vm56_vm0, %v1684_v16  ;;  %1801 = vmatprep.mubr.msk.f32.mxu1 %vm56_vm0, %v485_v17 }
  0x37   :  { %1149 = vperm.xlu1 %1912, %v2108_v2   ;;  %1795 = vmatmul.mubr.msk.f32.vlgmr.msra.gmra.mrb[4].mxu0 %vm56_vm0, %v1685_v18 }
  0x38   :  { %1802 = vmatmul.mubr.msk.f32.vlgmr.msra.gmra.mrb[4].mxu1 %vm56_vm0, %v486_v19  ;;  %1871 = vmatprep.subr.bf16.mxu0 %v2117_v5 }
  0x39   :  { %1875 = vmatprep.subr.bf16.mxu1 %v2117_v5  ;;  %1873 = vmatpush3.bf16.msra.mxu0 %v2117_v5 }
  0x3a   :  { %1877 = vmatpush3.bf16.msra.mxu1 %v2117_v5  ;;  %1808 = vmatprep.mubr.msk.f32.mxu0 %vm56_vm0, %v571_v21 }
  0x3b   :  { %1815 = vmatprep.mubr.msk.f32.mxu1 %vm56_vm0, %v1692_v22  ;;  %1913 = vset.pattern.permute.xlu1 %v2031_v25 }
  0x3c   :  { %1879 = vmatprep.subr.bf16.mxu0 %v2117_v5  ;;  %1809 = vmatmul.mubr.msk.f32.vlgmr.msra.gmra.mrb[6].mxu0 %vm56_vm0, %v572_v23 }
  0x3d   :  { %1816 = vmatmul.mubr.msk.f32.vlgmr.msra.gmra.mrb[6].mxu1 %vm56_vm0, %v1693_v24  ;;  %1883 = vmatprep.subr.bf16.mxu1 %v2117_v5 }
  0x3e   :  { %1163 = vperm.xlu1 %1913, %v2108_v2   ;;  %1881 = vmatpush3.bf16.msra.mxu0 %v2117_v5 }
  0x3f   :  { %1885 = vmatpush3.bf16.msra.mxu1 %v2117_v5  ;;  %1822 = vmatprep.mubr.msk.f32.mxu0 %vm56_vm0, %v744_v26 }
  0x40   :  { %1829 = vmatprep.mubr.msk.f32.mxu1 %vm56_vm0, %v830_v27  ;;  %1887 = vmatprep.subr.bf16.mxu0 %v2117_v5 }
  0x41   :  { %1891 = vmatprep.subr.bf16.mxu1 %v2117_v5  ;;  %1823 = vmatmul.mubr.msk.f32.vlgmr.msra.gmra.mrb[8].mxu0 %vm56_vm0, %v745_v28 }
  0x42   :  { %1830 = vmatmul.mubr.msk.f32.vlgmr.msra.gmra.mrb[8].mxu1 %vm56_vm0, %v831_v29  ;;  %1167 = vperm.xlu1 %1913, %v2126_v8  }
  0x43   :  { %1889 = vmatpush3.bf16.msra.mxu0 %v2117_v5  ;;  %1893 = vmatpush3.bf16.msra.mxu1 %v2117_v5 }
  0x44   :  { %1836 = vmatprep.mubr.msk.f32.mxu0 %vm56_vm0, %v1700_v30  ;;  %1843 = vmatprep.mubr.msk.f32.mxu1 %vm56_vm0, %v1003_v31 }
  0x45   :  { %1256 = vperm.xlu0 %1909, %v2199_v32  }
  0x46   :  { %1837 = vmatmul.mubr.msk.f32.vlgmr.msra.gmra.mrb[10].mxu0 %vm56_vm0, %v1701_v33  ;;  %1844 = vmatmul.mubr.msk.f32.vlgmr.msra.gmra.mrb[10].mxu1 %vm56_vm0, %v1004_v34 }
  0x47   :  { %1914 = vset.pattern.permute.xlu1 %v2032_v36 }
  0x48   :  { %1181 = vperm.xlu1 %1914, %v2126_v8  }
  0x49   :  { %1394 = vperm.xlu0 %1909, %v2214_v35  }
  0x4c   :  { %1915 = vset.pattern.permute.xlu1 %v2033_v37 }
  0x4d   :  { %1191 = vperm.xlu1 %1915, %v2108_v2   ;;  %1928 = vset.pattern.permute.xlu0 %v2030_v20 }
  0x4e   :  { %1153 = vperm.xlu0 %1928, %v2126_v8  }
  0x51   :  { %1916 = vset.pattern.permute.xlu1 %v2034_v38 }
  0x52   :  { %1205 = vperm.xlu1 %1916, %v2108_v2   ;;  %1296 = vperm.xlu0 %1928, %v2199_v32  }
  0x56   :  { %1209 = vperm.xlu1 %1916, %v2126_v8   ;;  %1434 = vperm.xlu0 %1928, %v2214_v35  }
  0x5a   :  { %1917 = vset.pattern.permute.xlu1 %v2035_v39  ;;  %1932 = vset.pattern.permute.xlu0 %v2033_v37 }
  0x5b   :  { %1223 = vperm.xlu1 %1917, %v2126_v8   ;;  %1195 = vperm.xlu0 %1932, %v2126_v8  }
  0x5f   :  { %1918 = vset.pattern.permute.xlu1 %v2028_v1  ;;  %1338 = vperm.xlu0 %1932, %v2199_v32  }
  0x60   :  { %1251 = vperm.xlu1 %1918, %v1708_v40  }
  0x63   :  { %1476 = vperm.xlu0 %1932, %v2214_v35  }
  0x64   :  { %1919 = vset.pattern.permute.xlu1 %v2027_v0 }
  0x65   :  { %1264 = vperm.xlu1 %1919, %v1708_v40  }
  0x67   :  { %1937 = vset.pattern.permute.xlu0 %v2027_v0 }
  0x68   :  { %1540 = vperm.xlu0 %1937, %v2243_v41  }
  0x69   :  { %1268 = vperm.xlu1 %1919, %v2199_v32  }
  0x6c   :  { %1938 = vset.pattern.permute.xlu0 %v2029_v15 }
  0x6d   :  { %1920 = vset.pattern.permute.xlu1 %v2029_v15  ;;  %1135 = vperm.xlu0 %1938, %v2108_v2  }
  0x6e   :  { %1282 = vperm.xlu1 %1920, %v2199_v32  }
  0x71   :  { %1278 = vperm.xlu0 %1938, %v1708_v40  }
  0x72   :  { %1921 = vset.pattern.permute.xlu1 %v2030_v20 }
  0x73   :  { %1292 = vperm.xlu1 %1921, %v1708_v40  }
  0x75   :  { %1416 = vperm.xlu0 %1938, %v2256_v42  }
  0x77   :  { %1922 = vset.pattern.permute.xlu1 %v2031_v25 }
  0x78   :  { %1306 = vperm.xlu1 %1922, %v1708_v40  }
  0x79   :  { %1558 = vperm.xlu0 %1938, %v2262_v43  }
  0x7c   :  { %1310 = vperm.xlu1 %1922, %v2199_v32  }
  0x7d   :  { %1942 = vset.pattern.permute.xlu0 %v2031_v25 }
  0x7e   :  { %1582 = vperm.xlu0 %1942, %v2243_v41  }
  0x80   :  { %1923 = vset.pattern.permute.xlu1 %v2032_v36 }
  0x81   :  { %1324 = vperm.xlu1 %1923, %v2199_v32  }
  0x82   :  { %1943 = vset.pattern.permute.xlu0 %v2032_v36 }
  0x83   :  { %1177 = vperm.xlu0 %1943, %v2108_v2  }
  0x85   :  { %1924 = vset.pattern.permute.xlu1 %v2033_v37 }
  0x86   :  { %1334 = vperm.xlu1 %1924, %v1708_v40  }
  0x87   :  { %1320 = vperm.xlu0 %1943, %v1708_v40  }
  0x8a   :  { %1925 = vset.pattern.permute.xlu1 %v2034_v38 }
  0x8b   :  { %1348 = vperm.xlu1 %1925, %v1708_v40   ;;  %1458 = vperm.xlu0 %1943, %v2256_v42  }
  0x8f   :  { %1352 = vperm.xlu1 %1925, %v2199_v32   ;;  %1600 = vperm.xlu0 %1943, %v2262_v43  }
  0x93   :  { %1926 = vset.pattern.permute.xlu1 %v2035_v39  ;;  %1947 = vset.pattern.permute.xlu0 %v2034_v38 }
  0x94   :  { %1366 = vperm.xlu1 %1926, %v2199_v32   ;;  %1486 = vperm.xlu0 %1947, %v2256_v42  }
  0x98   :  { %1927 = vset.pattern.permute.xlu1 %v2028_v1  ;;  %1628 = vperm.xlu0 %1947, %v2262_v43  }
  0x99   :  { %1389 = vperm.xlu1 %1927, %v2256_v42  }
  0x9c   :  { %1949 = vset.pattern.permute.xlu0 %v2035_v39 }
  0x9d   :  { %1929 = vset.pattern.permute.xlu1 %v2027_v0  ;;  %1219 = vperm.xlu0 %1949, %v2108_v2  }
  0x9e   :  { %1402 = vperm.xlu1 %1929, %v2256_v42  }
  0xa1   :  { %1362 = vperm.xlu0 %1949, %v1708_v40  }
  0xa2   :  { %1406 = vperm.xlu1 %1929, %v2214_v35  }
  0xa5   :  { %1504 = vperm.xlu0 %1949, %v2214_v35  }
  0xa6   :  { %1930 = vset.pattern.permute.xlu1 %v2029_v15 }
  0xa7   :  { %1420 = vperm.xlu1 %1930, %v2214_v35   ;;  %v2293_v44 = vpop.permute.xlu1 %1121  ;;  %v2306_v48 = vpop.permute.xlu0 %1108 }
  0xab   :  { %1931 = vset.pattern.permute.xlu1 %v2030_v20  ;;  %v2297_v45 = vpop.permute.xlu1 %1125 }
  0xac   :  { %1430 = vperm.xlu1 %1931, %v2256_v42  }
  0xad   :  { %v2313_v50 = vpop.permute.xlu0 %1113 }
  0xb0   :  { %1933 = vset.pattern.permute.xlu1 %v2031_v25  ;;  %v2301_v46 = vpop.permute.xlu1 %1139 }
  0xb1   :  { %1444 = vperm.xlu1 %1933, %v2256_v42  }
  0xb5   :  { %1448 = vperm.xlu1 %1933, %v2214_v35  }
  0xb6   :  { %v2304_v47 = vpop.permute.xlu1 %1149 }
  0xb9   :  { %1934 = vset.pattern.permute.xlu1 %v2032_v36 }
  0xba   :  { %1462 = vperm.xlu1 %1934, %v2214_v35  }
  0xbd   :  { %v2310_v49 = vpop.permute.xlu1 %1163 }
  0xbe   :  { %1935 = vset.pattern.permute.xlu1 %v2033_v37 }
  0xbf   :  { %1472 = vperm.xlu1 %1935, %v2256_v42  }
  0xc1   :  { %v2316_v51 = vpop.permute.xlu1 %1167 }
  0xc3   :  { %1936 = vset.pattern.permute.xlu1 %v2028_v1 }
  0xc4   :  { %1527 = vperm.xlu1 %1936, %v2243_v41   ;;  %v2320_v52 = vpop.permute.xlu0 %1256 }
  0xc7   :  { %v2322_v53 = vpop.permute.xlu1 %1181 }
  0xc8   :  { %1532 = vperm.xlu1 %1936, %v2262_v43   ;;  %v2325_v54 = vpop.permute.xlu0 %1394 }
  0xcc   :  { %1939 = vset.pattern.permute.xlu1 %v2027_v0  ;;  %v2328_v55 = vpop.permute.xlu1 %1191 }
  0xcd   :  { %1544 = vperm.xlu1 %1939, %v2262_v43   ;;  %v2331_v56 = vpop.permute.xlu0 %1153 }
  0xd1   :  { %1940 = vset.pattern.permute.xlu1 %v2029_v15  ;;  %v2334_v57 = vpop.permute.xlu1 %1205  ;;  %v2336_v58 = vpop.permute.xlu0 %1296 }
  0xd2   :  { %1554 = vperm.xlu1 %1940, %v2243_v41  }
  0xd5   :  { %v2339_v59 = vpop.permute.xlu1 %1209  ;;  %v2341_v60 = vpop.permute.xlu0 %1434 }
  0xd6   :  { %1941 = vset.pattern.permute.xlu1 %v2030_v20 }
  0xd7   :  { %1568 = vperm.xlu1 %1941, %v2243_v41  }
  0xda   :  { %v2345_v61 = vpop.permute.xlu1 %1223  ;;  %v2347_v62 = vpop.permute.xlu0 %1195 }
  0xdb   :  { %1572 = vperm.xlu1 %1941, %v2262_v43  }
  0xde   :  { %v2350_v63 = vpop.permute.xlu0 %1338 }
  0xdf   :  { %1944 = vset.pattern.permute.xlu1 %v2031_v25  ;;  %v2353_v0 = vpop.permute.xlu1 %1251 }
  0xe0   :  { %1586 = vperm.xlu1 %1944, %v2262_v43  }
  0xe2   :  { %v2356_v1 = vpop.permute.xlu0 %1476 }
  0xe4   :  { %1945 = vset.pattern.permute.xlu1 %v2032_v36  ;;  %v2359_v2 = vpop.permute.xlu1 %1264 }
  0xe5   :  { %1596 = vperm.xlu1 %1945, %v2243_v41  }
  0xe7   :  { %v1541_v3 = vpop.permute.xlu0 %1540 }
  0xe8   :  { %v2362_v4 = vpop.permute.xlu1 %1268 }
  0xe9   :  { %1946 = vset.pattern.permute.xlu1 %v2033_v37 }
  0xea   :  { %1610 = vperm.xlu1 %1946, %v2243_v41  }
  0xec   :  { %v2366_v5 = vpop.permute.xlu0 %1135 }
  0xed   :  { %v2368_v6 = vpop.permute.xlu1 %1282 }
  0xee   :  { %1614 = vperm.xlu1 %1946, %v2262_v43  }
  0xf0   :  { %v2371_v7 = vpop.permute.xlu0 %1278 }
  0xf2   :  { %1948 = vset.pattern.permute.xlu1 %v2034_v38  ;;  %v2374_v8 = vpop.permute.xlu1 %1292 }
  0xf3   :  { %1490 = vperm.xlu1 %1948, %v2214_v35  }
  0xf4   :  { %v2377_v9 = vpop.permute.xlu0 %1416 }
  0xf7   :  { %1624 = vperm.xlu1 %1948, %v2243_v41   ;;  %v2380_v10 = vpop.permute.xlu1 %1306 }
  0xf8   :  { %v2382_v11 = vpop.permute.xlu0 %1558 }
  0xfb   :  { %1950 = vset.pattern.permute.xlu1 %v2035_v39  ;;  %v2385_v12 = vpop.permute.xlu1 %1310 }
  0xfc   :  { %1500 = vperm.xlu1 %1950, %v2256_v42  }
  0xfd   :  { %v2388_v13 = vpop.permute.xlu0 %1582 }
 0x100   :  { %1638 = vperm.xlu1 %1950, %v2243_v41   ;;  %v2391_v14 = vpop.permute.xlu1 %1324 }
 0x101   :  { %v1768_v16 = vpop.f32.mrb[0].mxu0 }
 0x102   :  { %v1775_v15 = vpop.f32.mrb[0].mxu1  ;;  %140 = vst.msk [vmem:[#allocation2 + $0x8] sm:$0xff] %vm138_vm1, %v1768_v16  ;;  %v129_v18 = vpop.f32.mrb[1].mxu0 }
 0x103   :  { %225 = vst.msk [vmem:[#allocation2 + $0x18] sm:$0xff] %vm138_vm1, %v1775_v15  ;;  %v215_v17 = vpop.f32.mrb[1].mxu1  ;;  %v2397_v19 = vpop.permute.xlu0 %1177 }
 0x104   :  { %1642 = vperm.xlu1 %1950, %v2262_v43   ;;  %224 = vst.msk [vmem:[#allocation2 + $0x10] sm:$0xff] %vm138_vm1, %v215_v17 }
 0x105   :  { %v2399_v20 = vpop.permute.xlu1 %1334  ;;  %v1782_v21 = vpop.f32.mrb[2].mxu0 }
 0x106   :  { %v1789_v22 = vpop.f32.mrb[2].mxu1  ;;  %v300_v23 = vpop.f32.mrb[3].mxu0 }
 0x107   :  { %397 = vst.msk [vmem:[#allocation2 + $0x38] sm:$0xff] %vm138_vm1, %v1789_v22  ;;  %v386_v24 = vpop.f32.mrb[3].mxu1  ;;  %309 = vst.msk [vmem:[#allocation2 + $0x20] sm:$0xff] %vm138_vm1, %v300_v23  ;;  %v2403_v25 = vpop.permute.xlu0 %1320 }
 0x10a   :  { %v2405_v26 = vpop.permute.xlu1 %1348  ;;  %v1796_v27 = vpop.f32.mrb[4].mxu0  ;;  %v1105_v21 = vld [vmem:[#allocation2 + $0x18] sm:$0xff] }
 0x10b   :  { %v1803_v28 = vpop.f32.mrb[4].mxu1  ;;  %483 = vst.msk [vmem:[#allocation2 + $0x48] sm:$0xff] %vm138_vm1, %v1796_v27  ;;  %v473_v29 = vpop.f32.mrb[5].mxu0  ;;  %v2408_v31 = vld [vmem:[#allocation2 + $0xf] sm:$0xff] }
 0x10c   :  { %v559_v30 = vpop.f32.mrb[5].mxu1  ;;  %482 = vst.msk [vmem:[#allocation2 + $0x40] sm:$0xff] %vm138_vm1, %v473_v29  ;;  %v2412_v32 = vpop.permute.xlu0 %1458  ;;  %v2415_v33 = vmul.f32 %v1541_v3, %v2408_v31  ;;  %v2429_v3 = vld [vmem:[#allocation2 + $0x17] sm:$0xff] }
 0x10d   :  { %568 = vst.msk [vmem:[#allocation2 + $0x50] sm:$0xff] %vm138_vm1, %v559_v30  ;;  %v1272_v28 = vmul.f32 %v2362_v4, %v2429_v3  ;;  %v1129_v4 = vmul.f32 %v2297_v45, %v2429_v3  ;;  %v1090_v45 = vlaneseq }
 0x10e   :  { %v2417_v34 = vpop.permute.xlu1 %1352  ;;  %v2421_v39 = vld [vmem:[#allocation2 + $0x19] sm:$0xff] }
 0x10f   :  { %v1810_v36 = vpop.f32.mrb[6].mxu0 }
 0x110   :  { %v1817_v35 = vpop.f32.mrb[6].mxu1  ;;  %656 = vst.msk [vmem:[#allocation2 + $0x68] sm:$0xff] %vm138_vm1, %v1810_v36  ;;  %v645_v38 = vpop.f32.mrb[7].mxu0 }
 0x111   :  { %742 = vst.msk [vmem:[#allocation2 + $0x78] sm:$0xff] %vm138_vm1, %v1817_v35  ;;  %v732_v37 = vpop.f32.mrb[7].mxu1  ;;  %v1601_v40 = vpop.permute.xlu0 %1600  ;;  %v1104_v35 = vld [vmem:[#allocation2 + $0x10] sm:$0xff]  ;;  %v1117_v38 = vmul.f32 %v2313_v50, %v1105_v21 }
 0x112   :  { %741 = vst.msk [vmem:[#allocation2 + $0x70] sm:$0xff] %vm138_vm1, %v732_v37  ;;  %v1248_v41 = vld [vmem:[#allocation2 + $0x48] sm:$0xff]  ;;  %v2427_v43 = vmul.f32 %v1601_v40, %v2421_v39 }
 0x113   :  { %v2424_v42 = vpop.permute.xlu1 %1366  ;;  %v1260_v15 = vmul.f32 %v2320_v52, %v1248_v41  ;;  %v1247_v18 = vld [vmem:[#allocation2 + $0x40] sm:$0xff] }
 0x114   :  { %v1824_v16 = vpop.f32.mrb[8].mxu0  ;;  %v2432_v22 = vld [vmem:[#allocation2 + $0x47] sm:$0xff]  ;;  %v2435_v27 = vld [vmem:[#allocation2 + $0x3f] sm:$0xff]  ;;  %v1259_v36 = vmul.f32 %v2353_v0, %v1247_v18  ;;  %v1271_v0 = vmul.f32 %v2408_v31, %v2359_v2 }
 0x115   :  { %v1831_v17 = vpop.f32.mrb[8].mxu1  ;;  %v818_v23 = vpop.f32.mrb[9].mxu0  ;;  %v1423_v52 = vmul.f32 %v2377_v9, %v2435_v27  ;;  %v2447_v37 = vmul.f32 %v2382_v11, %v2432_v22  ;;  %v1274_v40 = vadd.f32 %v1272_v28, %v1260_v15  ;;  %v1286_v41 = vmul.f32 %v2368_v6, %v2432_v22 }
 0x116   :  { %915 = vst.msk [vmem:[#allocation2 + $0x98] sm:$0xff] %vm138_vm1, %v1831_v17  ;;  %v904_v24 = vpop.f32.mrb[9].mxu1  ;;  %827 = vst.msk [vmem:[#allocation2 + $0x80] sm:$0xff] %vm138_vm1, %v818_v23  ;;  %v2440_v29 = vpop.permute.xlu0 %1486  ;;  %v1116_v15 = vmul.f32 %v2306_v48, %v1104_v35  ;;  %v1128_v6 = vmul.f32 %v2408_v31, %v2293_v44  ;;  %v1143_v23 = vmul.f32 %v2301_v46, %v2432_v22  ;;  %v2474_v35 = vld [vmem:[#allocation2 + $0x11] sm:$0xff] }
 0x117   :  { %v1273_v24 = vadd.f32 %v1271_v0, %v1259_v36  ;;  %v1285_v28 = vmul.f32 %v2371_v7, %v2435_v27  ;;  %v1142_v48 = vmul.f32 %v2366_v5, %v2435_v27  ;;  %v2481_v0 = vshrl.u32 %v1090_v45, 7 }
 0x118   :  { %v1390_v30 = vpop.permute.xlu1 %1389  ;;  %v1130_v7 = vadd.f32 %v1128_v6, %v1116_v15  ;;  %v1328_v15 = vmul.f32 %v2391_v14, %v2421_v39 }
 0x119   :  { %v1838_v16 = vpop.f32.mrb[10].mxu0  ;;  %v1845_v9 = vpop.f32.mrb[10].mxu1  ;;  %v2457_v18 = vld [vmem:[#allocation2 + $0x77] sm:$0xff]  ;;  %v2468_v2 = vld [vmem:[#allocation2 + $0x6f] sm:$0xff]  ;;  %v1287_v5 = vadd.f32 %v1285_v28, %v1273_v24  ;;  %vm1096_vm2 = vcmp.lt.s32.totalorder %v2481_v0, 2 }
 0x11a   :  { %1001 = vst.msk [vmem:[#allocation2 + $0xa8] sm:$0xff] %vm138_vm1, %v1838_v16  ;;  %v991_v17 = vpop.f32.mrb[11].mxu0  ;;  %v1385_v11 = vld [vmem:[#allocation2 + $0x70] sm:$0xff]  ;;  %v1077_v50 = vpop.f32.mrb[11].mxu1  ;;  %v1131_v16 = vadd.f32 %v1129_v4, %v1117_v38  ;;  %v1288_v9 = vadd.f32 %v1286_v41, %v1274_v40  ;;  %v1157_v44 = vmul.f32 %v2331_v56, %v2457_v18  ;;  %v1300_v46 = vmul.f32 %v2336_v58, %v2457_v18 }
 0x11b   :  { %1000 = vst.msk [vmem:[#allocation2 + $0xa0] sm:$0xff] %vm138_vm1, %v991_v17  ;;  %v2460_v21 = vpop.permute.xlu0 %1628  ;;  %1086 = vst.msk [vmem:[#allocation2 + $0xb0] sm:$0xff] %vm138_vm1, %v1077_v50  ;;  %v1397_v50 = vmul.f32 %v1390_v30, %v1385_v11  ;;  %v1156_v38 = vmul.f32 %v2304_v47, %v2468_v2  ;;  %v1299_v41 = vmul.f32 %v2374_v8, %v2468_v2  ;;  %v2491_v30 = vld [vmem:[#allocation2 + $0x49] sm:$0xff] }
 0x11c   :  { %v1145_v4 = vadd.f32 %v1143_v23, %v1131_v16  ;;  %v1185_v56 = vmul.f32 %v2322_v53, %v2421_v39  ;;  %v1184_v58 = vmul.f32 %v2397_v19, %v2474_v35  ;;  %v1144_v47 = vadd.f32 %v1142_v48, %v1130_v7 }
 0x11d   :  { %v1403_v17 = vpop.permute.xlu1 %1402  ;;  %v1302_v23 = vadd.f32 %v1300_v46, %v1288_v9  ;;  %v1199_v14 = vmul.f32 %v2347_v62, %v2491_v30  ;;  %v2511_v9 = vld [vmem:[#allocation2 + $0x71] sm:$0xff]  ;;  %v1301_v48 = vadd.f32 %v1299_v41, %v1287_v5 }
 0x11e   :  { %v1409_v36 = vmul.f32 %v1403_v17, %v2408_v31  ;;  %v1327_v31 = vmul.f32 %v2403_v25, %v2474_v35  ;;  %v1159_v6 = vadd.f32 %v1157_v44, %v1145_v4  ;;  %v1158_v25 = vadd.f32 %v1156_v38, %v1144_v47  ;;  %v2507_v17 = vld [vmem:[#allocation2 + $0x41] sm:$0xff]  ;;  %v2521_v44 = vld [vmem:[#allocation2 + $0x79] sm:$0xff] }
 0x11f   :  { %v1220_v45 = vpop.permute.xlu0 %1219  ;;  %v1198_v62 = vmul.f32 %v2328_v55, %v2507_v17  ;;  %v1212_v4 = vmul.f32 %v2511_v9, %v2334_v57  ;;  %v1213_v47 = vmul.f32 %v2339_v59, %v2521_v44  ;;  %v1356_v55 = vmul.f32 %v2417_v34, %v2521_v44 }
 0x120   :  { %v1411_v40 = vadd.f32 %v1409_v36, %v1397_v50 }
 0x121   :  { %v1407_v11 = vpop.permute.xlu1 %1406 }
 0x122   :  { %v2497_v8 = vld [vmem:[#allocation2 + $0xa7] sm:$0xff]  ;;  %v2499_v24 = vld [vmem:[#allocation2 + $0x9f] sm:$0xff]  ;;  %v1425_v53 = vadd.f32 %v1423_v52, %v1411_v40  ;;  %v1410_v57 = vmul.f32 %v1407_v11, %v2429_v3 }
 0x123   :  { %v1171_v19 = vmul.f32 %v2316_v51, %v2497_v8  ;;  %v1314_v28 = vmul.f32 %v2385_v12, %v2497_v8  ;;  %v1170_v16 = vmul.f32 %v2310_v49, %v2499_v24  ;;  %v1313_v52 = vmul.f32 %v2380_v10, %v2499_v24  ;;  %v2526_v7 = vld [vmem:[#allocation2 + $0xa1] sm:$0xff]  ;;  %v2530_v38 = vld [vmem:[#allocation2 + $0xa9] sm:$0xff]  ;;  %v1363_v40 = vpop.permute.xlu0 %1362  ;;  %v2552_v11 = vld [vmem:[%s2630_s4] ss:$0 sm:$0xff]  ;;  %s2037_s4 = smov [#allocation8]  }
 0x124   :  { %v2517_v51 = vmul.f32 %v2388_v13, %v2499_v24  ;;  %v1342_v12 = vmul.f32 %v2350_v63, %v2491_v30  ;;  %v1341_v13 = vmul.f32 %v2399_v20, %v2507_v17  ;;  %v1386_v20 = vld [vmem:[#allocation2 + $0x78] sm:$0xff]  ;;  %v1227_v59 = vmul.f32 %v2345_v61, %v2530_v38  ;;  %s1663_s9 = sshll.u32 %s2037_s4, 4  ;;  %s1664_s9 = int_to_ptr.vmem [resolvable:$true] %s1663_s9 }
 0x125   :  { %v1173_v49 = vadd.f32 %v1171_v19, %v1159_v6  ;;  %v1316_v46 = vadd.f32 %v1314_v28, %v1302_v23  ;;  %v1172_v50 = vadd.f32 %v1170_v16, %v1158_v25  ;;  %v1315_v10 = vadd.f32 %v1313_v52, %v1301_v48  ;;  %s1995_s10 = scalar_lea.vmem %s1664_s9, 1024  ;;  %p2000_p3 = scmp.lt.s32.totalorder %s1664_s9, %s1664_s9 }
 0x126   :  { %v1421_v36 = vpop.permute.xlu1 %1420  ;;  %v1355_v23 = vmul.f32 %v2511_v9, %v2405_v26  ;;  %v1370_v26 = vmul.f32 %v2424_v42, %v2530_v38  ;;  %v1398_v52 = vmul.f32 %v2325_v54, %v1386_v20  ;;  %p1996_p2 = scmp.ne.s32.totalorder %s1664_s9, %s1995_s10  ;;  %p2001_p4 = scmp.lt.s32.totalorder %s1995_s10, %s1995_s10 }
 0x127   :  { %v1186_v63 = vadd.f32 %v1184_v58, %v1172_v50  ;;  %v1187_v5 = vadd.f32 %v1185_v56, %v1173_v49  ;;  %v1330_v41 = vadd.f32 %v1328_v15, %v1316_v46  ;;  %v1329_v6 = vadd.f32 %v1327_v31, %v1315_v10 }
 0x128   :  { %v1226_v58 = vmul.f32 %v1220_v45, %v2526_v7  ;;  %v1369_v15 = vmul.f32 %v1363_v40, %v2526_v7  ;;  %v1424_v45 = vmul.f32 %v1421_v36, %v2432_v22  ;;  %v1412_v50 = vadd.f32 %v1410_v57, %v1398_v52  ;;  %p2002_p5 = por %p2001_p4, %p2000_p3 }
 0x129   :  { %v1200_v19 = vadd.f32 %v1198_v62, %v1186_v63  ;;  %v1201_v28 = vadd.f32 %v1199_v14, %v1187_v5  ;;  %v1344_v25 = vadd.f32 %v1342_v12, %v1330_v41  ;;  %v1343_v56 = vadd.f32 %v1341_v13, %v1329_v6 }
 0x12a   :  { %v2036_v13 = vmov 0.0   ;;  %v1465_v63 = vmul.f32 %v2412_v32, %v2474_v35  ;;  %p2003_p6 = pnand %p2002_p5, %p1996_p2 }
 0x12b   :  { %v1214_v16 = vadd.f32 %v1212_v4, %v1200_v19  ;;  %v1431_v34 = vpop.permute.xlu1 %1430  ;;  %v1215_v31 = vadd.f32 %v1213_v47, %v1201_v28  ;;  %v1358_v48 = vadd.f32 %v1356_v55, %v1344_v25  ;;  %v1357_v14 = vadd.f32 %v1355_v23, %v1343_v56 }
 0x12c   :  { %v1437_v12 = vmul.f32 %v1431_v34, %v2468_v2  ;;  %v2557_v54 = vsel %vm1096_vm2, 1.0, %v2036_v13  ;;  %v1426_v4 = vadd.f32 %v1424_v45, %v1412_v50 }
 0x12d   :  { %v1228_v61 = vadd.f32 %v1226_v58, %v1214_v16  ;;  %v1229_v49 = vadd.f32 %v1227_v59, %v1215_v31  ;;  %v1372_v46 = vadd.f32 %v1370_v26, %v1358_v48  ;;  %v1371_v62 = vadd.f32 %v1369_v15, %v1357_v14 }
 0x12e   :  { %v1439_v10 = vadd.f32 %v1437_v12, %v1425_v53  ;;  %v1438_v53 = vmul.f32 %v2341_v60, %v2457_v18  ;;  %v1480_v16 = vmul.f32 %v2356_v1, %v2491_v30  ;;  %v1493_v48 = vmul.f32 %v2440_v29, %v2511_v9 }
 0x12f   :  { %v1236_v42 = vadd.f32 %v2552_v11, %v1228_v61  ;;  %v1237_v22 = vadd.f32 %v2552_v11, %v1229_v49  ;;  %v1374_v36 = vadd.f32 %v2552_v11, %v1372_v46  ;;  %v1373_v40 = vadd.f32 %v2552_v11, %v1371_v62  ;;  %v1523_v61 = vld [vmem:[#allocation2 + $0xa0] sm:$0xff] }
 0x130   :  { %v1445_v5 = vpop.permute.xlu1 %1444  ;;  %v1440_v25 = vadd.f32 %v1438_v53, %v1426_v4 }
 0x131   :  { %v1238_v41 = vmax.f32 %v1236_v42, 0.0  ;;  %v1451_v0 = vmul.f32 %v1445_v5, %v2499_v24  ;;  %v1239_v47 = vmax.f32 %v1237_v22, 0.0  ;;  %v1376_v55 = vmax.f32 %v1374_v36, 0.0 }
 0x132   :  { %v1375_v6 = vmax.f32 %v1373_v40, 0.0 }
 0x133   :  { %v1240_v23 = vmul.f32 %v2557_v54, %v1238_v41  ;;  %v1453_v20 = vadd.f32 %v1451_v0, %v1439_v10  ;;  %v1241_v19 = vmul.f32 0.0, %v1239_v47  ;;  %v1378_v58 = vmul.f32 0.0, %v1376_v55  ;;  %v1524_v10 = vld [vmem:[#allocation2 + $0xa8] sm:$0xff] }
 0x134   :  { %v1377_v32 = vmul.f32 %v2557_v54, %v1375_v6  ;;  %v1449_v28 = vpop.permute.xlu1 %1448  ;;  %v1632_v6 = vmul.f32 %v2460_v21, %v2521_v44 }
 0x135   :  { %1242 = vst.msk [vmem:[#allocation8] sm:$0xff] %vm138_vm1, %v1240_v23  ;;  %v1452_v57 = vmul.f32 %v1449_v28, %v2497_v8  ;;  %v1467_v60 = vadd.f32 %v1465_v63, %v1453_v20  ;;  %1243 = vst.msk [vmem:[#allocation8 + $0x8] sm:$0xff] %vm138_vm1, %v1241_v19  ;;  %v1505_v20 = vpop.permute.xlu0 %1504 }
 0x136   :  { %1381 = vst.msk [vmem:[#allocation8 + $0x18] sm:$0xff] %vm138_vm1, %v1378_v58  ;;  %1380 = vst.msk [vmem:[#allocation8 + $0x10] sm:$0xff] %vm138_vm1, %v1377_v32  ;;  %v1508_v58 = vmul.f32 %v1505_v20, %v2530_v38 }
 0x137   :  { %v1454_v24 = vadd.f32 %v1452_v57, %v1440_v25 }
 0x139   :  { %v1463_v56 = vpop.permute.xlu1 %1462 }
 0x13a   :  { %v1466_v15 = vmul.f32 %v1463_v56, %v2421_v39 }
 0x13c   :  { %v1468_v59 = vadd.f32 %v1466_v15, %v1454_v24 }
 0x13e   :  { %v1473_v34 = vpop.permute.xlu1 %1472  ;;  %v1482_v31 = vadd.f32 %v1480_v16, %v1468_v59 }
 0x13f   :  { %v1479_v26 = vmul.f32 %v1473_v34, %v2507_v17 }
 0x141   :  { %v1481_v52 = vadd.f32 %v1479_v26, %v1467_v60 }
 0x143   :  { %v1528_v45 = vpop.permute.xlu1 %1527  ;;  %v1495_v14 = vadd.f32 %v1493_v48, %v1481_v52 }
 0x144   :  { %v1535_v46 = vmul.f32 %v1528_v45, %v1523_v61 }
 0x146   :  { %v1549_v39 = vadd.f32 %v2415_v33, %v1535_v46 }
 0x147   :  { %v1533_v12 = vpop.permute.xlu1 %1532 }
 0x148   :  { %v1536_v22 = vmul.f32 %v1533_v12, %v1524_v10 }
 0x14c   :  { %v1545_v49 = vpop.permute.xlu1 %1544 }
 0x14d   :  { %v1548_v13 = vmul.f32 %v1545_v49, %v2429_v3 }
 0x14f   :  { %v1550_v63 = vadd.f32 %v1548_v13, %v1536_v22 }
 0x151   :  { %v1555_v50 = vpop.permute.xlu1 %1554  ;;  %v1564_v53 = vadd.f32 %v2447_v37, %v1550_v63 }
 0x152   :  { %v1561_v62 = vmul.f32 %v1555_v50, %v2435_v27 }
 0x154   :  { %v1563_v1 = vadd.f32 %v1561_v62, %v1549_v39 }
 0x156   :  { %v1569_v42 = vpop.permute.xlu1 %1568 }
 0x157   :  { %v1575_v29 = vmul.f32 %v1569_v42, %v2468_v2 }
 0x159   :  { %v1577_v36 = vadd.f32 %v1575_v29, %v1563_v1 }
 0x15a   :  { %v1573_v4 = vpop.permute.xlu1 %1572 }
 0x15b   :  { %v1591_v40 = vadd.f32 %v2517_v51, %v1577_v36  ;;  %v1576_v5 = vmul.f32 %v1573_v4, %v2457_v18 }
 0x15d   :  { %v1578_v41 = vadd.f32 %v1576_v5, %v1564_v53 }
 0x15f   :  { %v1587_v33 = vpop.permute.xlu1 %1586 }
 0x160   :  { %v1590_v27 = vmul.f32 %v1587_v33, %v2497_v8 }
 0x162   :  { %v1592_v0 = vadd.f32 %v1590_v27, %v1578_v41 }
 0x164   :  { %v1597_v47 = vpop.permute.xlu1 %1596  ;;  %v1606_v3 = vadd.f32 %v2427_v43, %v1592_v0 }
 0x165   :  { %v1603_v43 = vmul.f32 %v1597_v47, %v2474_v35 }
 0x169   :  { %v1611_v55 = vpop.permute.xlu1 %1610 }
 0x16a   :  { %v1617_v57 = vmul.f32 %v1611_v55, %v2507_v17 }
 0x16d   :  { %v1615_v2 = vpop.permute.xlu1 %1614 }
 0x16e   :  { %v1618_v23 = vmul.f32 %v1615_v2, %v2491_v30  ;;  %v1605_v30 = vadd.f32 %v1603_v43, %v1591_v40 }
 0x170   :  { %v1620_v51 = vadd.f32 %v1618_v23, %v1606_v3 }
 0x172   :  { %v1491_v18 = vpop.permute.xlu1 %1490  ;;  %v1634_v19 = vadd.f32 %v1632_v6, %v1620_v51 }
 0x173   :  { %v1494_v37 = vmul.f32 %v1491_v18, %v2521_v44  ;;  %v1619_v44 = vadd.f32 %v1617_v57, %v1605_v30 }
 0x175   :  { %v1496_v8 = vadd.f32 %v1494_v37, %v1482_v31 }
 0x176   :  { %v1625_v32 = vpop.permute.xlu1 %1624 }
 0x177   :  { %v1510_v28 = vadd.f32 %v1508_v58, %v1496_v8  ;;  %v1631_v24 = vmul.f32 %v1625_v32, %v2511_v9 }
 0x179   :  { %v1512_v25 = vadd.f32 %v2552_v11, %v1510_v28  ;;  %v1633_v34 = vadd.f32 %v1631_v24, %v1619_v44 }
 0x17b   :  { %v1514_v21 = vmax.f32 %v1512_v25, 0.0  ;;  %v1501_v60 = vpop.permute.xlu1 %1500 }
 0x17c   :  { %v1507_v56 = vmul.f32 %v1501_v60, %v2526_v7 }
 0x17d   :  { %v1516_v15 = vmul.f32 0.0, %v1514_v21 }
 0x17e   :  { %v1509_v59 = vadd.f32 %v1507_v56, %v1495_v14 }
 0x17f   :  { %1519 = vst.msk [vmem:[#allocation8 + $0x28] sm:$0xff] %vm138_vm1, %v1516_v15  ;;  %v1639_v16 = vpop.permute.xlu1 %1638 }
 0x180   :  { %v1511_v35 = vadd.f32 %v2552_v11, %v1509_v59  ;;  %v1645_v31 = vmul.f32 %v1639_v16, %v2526_v7 }
 0x182   :  { %v1513_v48 = vmax.f32 %v1511_v35, 0.0  ;;  %v1647_v17 = vadd.f32 %v1645_v31, %v1633_v34 }
 0x183   :  { %v1643_v26 = vpop.permute.xlu1 %1642 }
 0x184   :  { %v1515_v52 = vmul.f32 %v2557_v54, %v1513_v48  ;;  %v1649_v9 = vadd.f32 %v2552_v11, %v1647_v17  ;;  %v1646_v45 = vmul.f32 %v1643_v26, %v2530_v38 }
 0x186   :  { %1518 = vst.msk [vmem:[#allocation8 + $0x20] sm:$0xff] %vm138_vm1, %v1515_v52  ;;  %v1651_v14 = vmax.f32 %v1649_v9, 0.0  ;;  %v1648_v12 = vadd.f32 %v1646_v45, %v1634_v19 }
 0x188   :  { %v1653_v61 = vmul.f32 %v2557_v54, %v1651_v14  ;;  %v1650_v49 = vadd.f32 %v2552_v11, %v1648_v12 }
 0x18a   :  { %1656 = vst.msk [vmem:[#allocation8 + $0x30] sm:$0xff] %vm138_vm1, %v1653_v61  ;;  %v1652_v7 = vmax.f32 %v1650_v49, 0.0 }
 0x18c   :  { %v1654_v46 = vmul.f32 0.0, %v1652_v7 }
 0x18e   :  { %1657 = vst.msk [vmem:[#allocation8 + $0x38] sm:$0xff] %vm138_vm1, %v1654_v46 }
 0x18f   :  { %2006 = shalt.err (!%p2003_p6)
}
 0x190   :  { %s2007_s13 = scalar_lea.hbm %s2632_s6, 1024 }
 0x191   :  { %p2008_p7 = scmp.ne.s32.totalorder %s2632_s6, %s2007_s13  ;;  %p2011_p8 = scmp.lt.u32.totalorder %s2007_s13, %s2632_s6 }
 0x193   :  { %p2013_p9 = pnand %p2011_p8, %p2008_p7 }
 0x195   :  { %2016 = shalt.err (!%p2013_p9)
}
 0x196   :  { %1669 = dma.vmem_to_hbm [thread:$0]  %s1664_s9, 1024, %s2632_s6, [#allocation5], %s2024_s7, %s2024_s7, %s2025_s8  }
 0x197   :  { %2021 = dma.done.wait [#allocation5], 1024  }
 0x198   :  { %2022 = vsyncadd [#allocation5], 4294966272 }
 0x199   :  { %1673 = vsyncpa [#allocation4], 1 }
 0x19a   :  { %1674 = vsyncpa [#allocation7], 1 }
 0x19b   :  { %1675 = vsyncpa [#allocation5], 1 }

</bundles_post_ra>
